<compile_context>
chip_gen: v6e
topology: v6e:2x2x1
jax: 0.10.0
libtpu: 0.0.40
codegen_flags: <defaults>
</compile_context>

<pallas_src>
import functools

import jax
import jax.numpy as jnp
from jax.experimental import pallas as pl
from jax.experimental.pallas import tpu as pltpu

IN_DIM = 28 * 28    # 784
HID_DIM = 400
LATENT_DIM = 20
LAT_PAD = 128       # latent padded to one full lane tile
TB_MAX = 512        # batch rows per grid step


def _round_up(n, m):
    return (n + m - 1) // m * m


def _vae_kernel(x_ref, w1_ref, b1_ref, wml_ref, bml_ref,
                w3_ref, b3_ref, w4_ref, b4_ref, eps_ref,
                recon_ref, mulv_ref, *, lat_pad):
    # ----- encode: h1 = relu(x @ W1 + b1)   (bf16 MXU operands, f32 accum) ----
    x = x_ref[...]                                                      # (TB, 784) bf16
    h1 = jnp.dot(x, w1_ref[...], preferred_element_type=jnp.float32) + b1_ref[...]
    h1 = jnp.maximum(h1, 0.0)                                           # (TB, 400) f32

    # ----- fused fc_mu / fc_logvar: one (400, 2*128) lane-dense matmul --------
    mulv = jnp.dot(h1.astype(jnp.bfloat16), wml_ref[...],
                   preferred_element_type=jnp.float32) + bml_ref[...]   # (TB, 256)
    mu = mulv[:, :lat_pad]                                              # lane-aligned split
    logvar = mulv[:, lat_pad:]

    # ----- reparameterise (f32): z = mu + eps * exp(0.5 * logvar) -------------
    z = mu + eps_ref[...] * jnp.exp(0.5 * logvar)                       # (TB, 128)

    # ----- decode: h3 = relu(z @ W3 + b3); recon = sigmoid(h3 @ W4 + b4) ------
    h3 = jnp.dot(z.astype(jnp.bfloat16), w3_ref[...],
                 preferred_element_type=jnp.float32) + b3_ref[...]
    h3 = jnp.maximum(h3, 0.0)                                           # (TB, 400)
    logits = jnp.dot(h3.astype(jnp.bfloat16), w4_ref[...],
                     preferred_element_type=jnp.float32) + b4_ref[...]  # (TB, 784)

    # sigmoid(x) == 0.5*(tanh(0.5*x)+1): single EUP transcendental.
    recon_ref[...] = (0.5 * (jnp.tanh(0.5 * logits) + 1.0)).astype(recon_ref.dtype)
    mulv_ref[...] = mulv                                                # mu || logvar slab


def init_params(key, latent_dim=LATENT_DIM):
    """Deterministic synthetic parameters. Weights stored as (in, out) so the
    kernel computes x @ W + b (equivalent to PyTorch's x @ W_t.T + b)."""
    ks = jax.random.split(key, 10)

    def lin(kw, kb, fan_in, fan_out):
        bound = 1.0 / jnp.sqrt(fan_in)
        w = jax.random.uniform(kw, (fan_in, fan_out), jnp.float32, -bound, bound)
        b = jax.random.uniform(kb, (1, fan_out), jnp.float32, -bound, bound)
        return w, b

    w1, b1 = lin(ks[0], ks[1], IN_DIM, HID_DIM)
    wmu, bmu = lin(ks[2], ks[3], HID_DIM, latent_dim)
    wlv, blv = lin(ks[4], ks[5], HID_DIM, latent_dim)
    w3, b3 = lin(ks[6], ks[7], latent_dim, HID_DIM)
    w4, b4 = lin(ks[8], ks[9], HID_DIM, IN_DIM)
    return dict(w1=w1, b1=b1, wmu=wmu, bmu=bmu, wlv=wlv, blv=blv,
                w3=w3, b3=b3, w4=w4, b4=b4)


@jax.jit
def vae_forward(x, params, eps):
    """x: (B, 1, 28, 28) or (B, 784) float32. Returns (recon, mu, logvar) f32."""
    B = x.shape[0]
    latent = params["wmu"].shape[1]
    assert latent <= LAT_PAD

    # --- batch tiling: >=2 grid steps when possible (v7x megacore), TB<=512 ---
    Bp = _round_up(B, 8)
    if Bp <= 2 * TB_MAX:
        TB = min(TB_MAX, max(8, _round_up(Bp // 2, 8)))
    else:
        TB = TB_MAX
    Bp = _round_up(Bp, TB)
    grid = (Bp // TB,)

    # --- bf16 I/O + bf16 resident weights; biases stay f32 -------------------
    x2 = x.reshape(B, IN_DIM).astype(jnp.bfloat16)
    if Bp != B:
        x2 = jnp.pad(x2, ((0, Bp - B), (0, 0)))

    # eps padded to a full 128-lane tile (extra lanes are zero -> z padding = 0).
    eps_p = jnp.zeros((Bp, LAT_PAD), jnp.float32)
    eps_p = eps_p.at[:B, :latent].set(eps.astype(jnp.float32))

    w1 = params["w1"].astype(jnp.bfloat16)                              # (784, 400)

    # Lane-dense fused mu||logvar weights: mu -> lanes [0,128), logvar -> [128,256).
    wml = jnp.zeros((HID_DIM, 2 * LAT_PAD), jnp.float32)
    wml = wml.at[:, :latent].set(params["wmu"])
    wml = wml.at[:, LAT_PAD:LAT_PAD + latent].set(params["wlv"])
    wml = wml.astype(jnp.bfloat16)                                      # (400, 256)
    bml = jnp.zeros((1, 2 * LAT_PAD), jnp.float32)
    bml = bml.at[:, :latent].set(params["bmu"])
    bml = bml.at[:, LAT_PAD:LAT_PAD + latent].set(params["blv"])

    # Decoder W3 zero-row padded to K=128 so padded z lanes contribute exactly 0.
    w3 = jnp.zeros((LAT_PAD, HID_DIM), jnp.float32)
    w3 = w3.at[:latent, :].set(params["w3"]).astype(jnp.bfloat16)       # (128, 400)
    w4 = params["w4"].astype(jnp.bfloat16)                              # (400, 784)

    def _resident(arr):  # full-extent block, same index every step -> fetched once
        return pl.BlockSpec(arr.shape, lambda i: (0,) * arr.ndim)

    flops = 2 * Bp * (IN_DIM * HID_DIM + HID_DIM * 2 * LAT_PAD
                      + LAT_PAD * HID_DIM + HID_DIM * IN_DIM)
    weight_bytes = (w1.size + wml.size + w3.size + w4.size) * 2 \
        + (params["b1"].size + bml.size + params["b3"].size + params["b4"].size) * 4
    bytes_accessed = (Bp * IN_DIM * 2 * 2          # x + recon (bf16)
                      + Bp * 2 * LAT_PAD * 4       # mu||logvar slab (f32)
                      + Bp * LAT_PAD * 4           # eps (f32)
                      + weight_bytes)

    recon, mulv = pl.pallas_call(
        functools.partial(_vae_kernel, lat_pad=LAT_PAD),
        out_shape=(
            jax.ShapeDtypeStruct((Bp, IN_DIM), jnp.bfloat16),
            jax.ShapeDtypeStruct((Bp, 2 * LAT_PAD), jnp.float32),
        ),
        grid_spec=pltpu.PrefetchScalarGridSpec(
            num_scalar_prefetch=0,
            grid=grid,
            in_specs=[
                pl.BlockSpec((TB, IN_DIM), lambda i: (i, 0)),    # x tile (bf16)
                _resident(w1), _resident(params["b1"]),
                _resident(wml), _resident(bml),
                _resident(w3), _resident(params["b3"]),
                _resident(w4), _resident(params["b4"]),
                pl.BlockSpec((TB, LAT_PAD), lambda i: (i, 0)),   # eps tile
            ],
            out_specs=(
                pl.BlockSpec((TB, IN_DIM), lambda i: (i, 0)),        # recon tile (bf16)
                pl.BlockSpec((TB, 2 * LAT_PAD), lambda i: (i, 0)),   # mu||logvar tile
            ),
        ),
        compiler_params=pltpu.CompilerParams(
            dimension_semantics=("parallel",),
            vmem_limit_bytes=32 << 20,
        ),
        cost_estimate=pl.CostEstimate(
            flops=flops,
            transcendentals=Bp * (LAT_PAD + IN_DIM),
            bytes_accessed=bytes_accessed,
        ),
    )(x2, w1, params["b1"], wml, bml, w3, params["b3"], w4, params["b4"], eps_p)

    recon = recon[:B].astype(jnp.float32)
    mu = mulv[:B, :latent]
    logvar = mulv[:B, LAT_PAD:LAT_PAD + latent]
    return recon, mu, logvar


def vae_forward_ref(x, params, eps, *, bf16_matmul=True):
    """Pure-JAX reference. bf16_matmul=True mirrors the kernel's mixed precision."""
    B = x.shape[0]
    x2 = x.reshape(B, IN_DIM).astype(jnp.float32)

    def mm(a, w):
        if bf16_matmul:
            return jnp.dot(a.astype(jnp.bfloat16), w.astype(jnp.bfloat16),
                           preferred_element_type=jnp.float32)
        return jnp.dot(a, w, preferred_element_type=jnp.float32)

    h1 = jnp.maximum(mm(x2, params["w1"]) + params["b1"], 0.0)
    mu = mm(h1, params["wmu"]) + params["bmu"]
    logvar = mm(h1, params["wlv"]) + params["blv"]
    z = mu + eps * jnp.exp(0.5 * logvar)
    h3 = jnp.maximum(mm(z, params["w3"]) + params["b3"], 0.0)
    recon = jax.nn.sigmoid(mm(h3, params["w4"]) + params["b4"])
    return recon, mu, logvar


if __name__ == "__main__":
    key = jax.random.PRNGKey(0)
    k_param, k_x, k_eps = jax.random.split(key, 3)

    B = 2
    params = init_params(k_param, latent_dim=LATENT_DIM)
    x = jax.random.uniform(k_x, (B, 1, 28, 28), jnp.float32)      # MNIST-like NCHW
    eps = jax.random.normal(k_eps, (B, LATENT_DIM), jnp.float32)  # reparam noise

    recon, mu, logvar = vae_forward(x, params, eps)
    jax.block_until_ready((recon, mu, logvar))

    assert recon.shape == (B, IN_DIM)
    assert mu.shape == (B, LATENT_DIM) and logvar.shape == (B, LATENT_DIM)

    # Same-semantics check (bf16 MXU operands / f32 accum). Recon passes through
    # a bf16 HBM store, so its tolerance reflects bf16 rounding of values in [0,1].
    r_ref, mu_ref, lv_ref = vae_forward_ref(x, params, eps, bf16_matmul=True)
    assert jnp.allclose(recon, r_ref, atol=5e-3, rtol=5e-3)
    assert jnp.allclose(mu, mu_ref, atol=1e-4, rtol=1e-4)
    assert jnp.allclose(logvar, lv_ref, atol=1e-4, rtol=1e-4)

    # Loose sanity check against a pure-f32 reference (bf16 rounding error only).
    r32, mu32, lv32 = vae_forward_ref(x, params, eps, bf16_matmul=False)
    assert jnp.allclose(recon, r32, atol=5e-2, rtol=5e-2)
    assert jnp.allclose(mu, mu32, atol=5e-2, rtol=5e-2)
    assert jnp.allclose(logvar, lv32, atol=5e-2, rtol=5e-2)

    print("KERNEL_OK")
</pallas_src>

<mosaic_0001>
module attributes {stable_mosaic.version = 11 : i64} {
  func.func @_vae_kernel(%arg0: i32, %arg1: memref<8x784xbf16, #tpu.memory_space<vmem>>, %arg2: memref<784x400xbf16, #tpu.memory_space<vmem>>, %arg3: memref<1x400xf32, #tpu.memory_space<vmem>>, %arg4: memref<400x256xbf16, #tpu.memory_space<vmem>>, %arg5: memref<1x256xf32, #tpu.memory_space<vmem>>, %arg6: memref<128x400xbf16, #tpu.memory_space<vmem>>, %arg7: memref<1x400xf32, #tpu.memory_space<vmem>>, %arg8: memref<400x784xbf16, #tpu.memory_space<vmem>>, %arg9: memref<1x784xf32, #tpu.memory_space<vmem>>, %arg10: memref<8x128xf32, #tpu.memory_space<vmem>>, %arg11: memref<8x784xbf16, #tpu.memory_space<vmem>>, %arg12: memref<8x256xf32, #tpu.memory_space<vmem>>) attributes {dimension_semantics = [#tpu.dimension_semantics<parallel>], iteration_bounds = array<i64: 1>, scalar_prefetch = 0 : i64, scratch_operands = 0 : i64, tpu.core_type = #tpu.core_type<tc>, window_params = [{transform_indices = @transform_0, window_bounds = array<i64: 8, 784>}, {pipeline_mode = #tpu.pipeline_mode<synchronous>, transform_indices = @transform_1, window_bounds = array<i64: 784, 400>}, {pipeline_mode = #tpu.pipeline_mode<synchronous>, transform_indices = @transform_2, window_bounds = array<i64: 1, 400>}, {pipeline_mode = #tpu.pipeline_mode<synchronous>, transform_indices = @transform_3, window_bounds = array<i64: 400, 256>}, {pipeline_mode = #tpu.pipeline_mode<synchronous>, transform_indices = @transform_4, window_bounds = array<i64: 1, 256>}, {pipeline_mode = #tpu.pipeline_mode<synchronous>, transform_indices = @transform_5, window_bounds = array<i64: 128, 400>}, {pipeline_mode = #tpu.pipeline_mode<synchronous>, transform_indices = @transform_6, window_bounds = array<i64: 1, 400>}, {pipeline_mode = #tpu.pipeline_mode<synchronous>, transform_indices = @transform_7, window_bounds = array<i64: 400, 784>}, {pipeline_mode = #tpu.pipeline_mode<synchronous>, transform_indices = @transform_8, window_bounds = array<i64: 1, 784>}, {transform_indices = @transform_9, window_bounds = array<i64: 8, 128>}, {transform_indices = @transform_10, window_bounds = array<i64: 8, 784>}, {transform_indices = @transform_11, window_bounds = array<i64: 8, 256>}]} {
    %c0 = arith.constant 0 : index
    %c0_0 = arith.constant 0 : index
    %0 = vector.load %arg1[%c0, %c0_0] : memref<8x784xbf16, #tpu.memory_space<vmem>>, vector<8x784xbf16>
    %c0_1 = arith.constant 0 : index
    %c0_2 = arith.constant 0 : index
    %1 = vector.load %arg2[%c0_1, %c0_2] : memref<784x400xbf16, #tpu.memory_space<vmem>>, vector<784x400xbf16>
    %cst = arith.constant dense<0.000000e+00> : vector<8x400xf32>
    %2 = tpu.matmul %0, %1, %cst {dimension_numbers = #tpu.dot_dimension_numbers<[1], [0], [0], [1], [0, 0, 1, 1], [], []>} : vector<8x784xbf16>, vector<784x400xbf16>, vector<8x400xf32> -> vector<8x400xf32>
    %c0_3 = arith.constant 0 : index
    %c0_4 = arith.constant 0 : index
    %3 = vector.load %arg3[%c0_3, %c0_4] : memref<1x400xf32, #tpu.memory_space<vmem>>, vector<1x400xf32>
    %4 = vector.broadcast %3 : vector<1x400xf32> to vector<8x400xf32>
    %5 = arith.addf %2, %4 : vector<8x400xf32>
    %cst_5 = arith.constant 0.000000e+00 : f32
    %6 = vector.broadcast %cst_5 : f32 to vector<8x400xf32>
    %7 = arith.maximumf %5, %6 : vector<8x400xf32>
    %8 = arith.truncf %7 : vector<8x400xf32> to vector<8x400xbf16>
    %c0_6 = arith.constant 0 : index
    %c0_7 = arith.constant 0 : index
    %9 = vector.load %arg4[%c0_6, %c0_7] : memref<400x256xbf16, #tpu.memory_space<vmem>>, vector<400x256xbf16>
    %cst_8 = arith.constant dense<0.000000e+00> : vector<8x256xf32>
    %10 = tpu.matmul %8, %9, %cst_8 {dimension_numbers = #tpu.dot_dimension_numbers<[1], [0], [0], [1], [0, 0, 1, 1], [], []>} : vector<8x400xbf16>, vector<400x256xbf16>, vector<8x256xf32> -> vector<8x256xf32>
    %c0_9 = arith.constant 0 : index
    %c0_10 = arith.constant 0 : index
    %11 = vector.load %arg5[%c0_9, %c0_10] : memref<1x256xf32, #tpu.memory_space<vmem>>, vector<1x256xf32>
    %12 = vector.broadcast %11 : vector<1x256xf32> to vector<8x256xf32>
    %13 = arith.addf %10, %12 : vector<8x256xf32>
    %14 = vector.extract_strided_slice %13 {offsets = [0, 0], sizes = [8, 128], strides = [1, 1]} : vector<8x256xf32> to vector<8x128xf32>
    %15 = vector.extract_strided_slice %13 {offsets = [0, 128], sizes = [8, 128], strides = [1, 1]} : vector<8x256xf32> to vector<8x128xf32>
    %c0_11 = arith.constant 0 : index
    %c0_12 = arith.constant 0 : index
    %16 = vector.load %arg10[%c0_11, %c0_12] : memref<8x128xf32, #tpu.memory_space<vmem>>, vector<8x128xf32>
    %cst_13 = arith.constant 5.000000e-01 : f32
    %17 = vector.broadcast %cst_13 : f32 to vector<8x128xf32>
    %18 = arith.mulf %17, %15 : vector<8x128xf32>
    %19 = math.exp %18 : vector<8x128xf32>
    %20 = arith.mulf %16, %19 : vector<8x128xf32>
    %21 = arith.addf %14, %20 : vector<8x128xf32>
    %22 = arith.truncf %21 : vector<8x128xf32> to vector<8x128xbf16>
    %c0_14 = arith.constant 0 : index
    %c0_15 = arith.constant 0 : index
    %23 = vector.load %arg6[%c0_14, %c0_15] : memref<128x400xbf16, #tpu.memory_space<vmem>>, vector<128x400xbf16>
    %cst_16 = arith.constant dense<0.000000e+00> : vector<8x400xf32>
    %24 = tpu.matmul %22, %23, %cst_16 {dimension_numbers = #tpu.dot_dimension_numbers<[1], [0], [0], [1], [0, 0, 1, 1], [], []>} : vector<8x128xbf16>, vector<128x400xbf16>, vector<8x400xf32> -> vector<8x400xf32>
    %c0_17 = arith.constant 0 : index
    %c0_18 = arith.constant 0 : index
    %25 = vector.load %arg7[%c0_17, %c0_18] : memref<1x400xf32, #tpu.memory_space<vmem>>, vector<1x400xf32>
    %26 = vector.broadcast %25 : vector<1x400xf32> to vector<8x400xf32>
    %27 = arith.addf %24, %26 : vector<8x400xf32>
    %cst_19 = arith.constant 0.000000e+00 : f32
    %28 = vector.broadcast %cst_19 : f32 to vector<8x400xf32>
    %29 = arith.maximumf %27, %28 : vector<8x400xf32>
    %30 = arith.truncf %29 : vector<8x400xf32> to vector<8x400xbf16>
    %c0_20 = arith.constant 0 : index
    %c0_21 = arith.constant 0 : index
    %31 = vector.load %arg8[%c0_20, %c0_21] : memref<400x784xbf16, #tpu.memory_space<vmem>>, vector<400x784xbf16>
    %cst_22 = arith.constant dense<0.000000e+00> : vector<8x784xf32>
    %32 = tpu.matmul %30, %31, %cst_22 {dimension_numbers = #tpu.dot_dimension_numbers<[1], [0], [0], [1], [0, 0, 1, 1], [], []>} : vector<8x400xbf16>, vector<400x784xbf16>, vector<8x784xf32> -> vector<8x784xf32>
    %c0_23 = arith.constant 0 : index
    %c0_24 = arith.constant 0 : index
    %33 = vector.load %arg9[%c0_23, %c0_24] : memref<1x784xf32, #tpu.memory_space<vmem>>, vector<1x784xf32>
    %34 = vector.broadcast %33 : vector<1x784xf32> to vector<8x784xf32>
    %35 = arith.addf %32, %34 : vector<8x784xf32>
    %cst_25 = arith.constant 5.000000e-01 : f32
    %36 = vector.broadcast %cst_25 : f32 to vector<8x784xf32>
    %37 = arith.mulf %36, %35 : vector<8x784xf32>
    %38 = math.tanh %37 : vector<8x784xf32>
    %cst_26 = arith.constant 1.000000e+00 : f32
    %39 = vector.broadcast %cst_26 : f32 to vector<8x784xf32>
    %40 = arith.addf %38, %39 : vector<8x784xf32>
    %cst_27 = arith.constant 5.000000e-01 : f32
    %41 = vector.broadcast %cst_27 : f32 to vector<8x784xf32>
    %42 = arith.mulf %41, %40 : vector<8x784xf32>
    %43 = arith.truncf %42 : vector<8x784xf32> to vector<8x784xbf16>
    %c0_28 = arith.constant 0 : index
    %c0_29 = arith.constant 0 : index
    %44 = vector.load %arg11[%c0_28, %c0_29] : memref<8x784xbf16, #tpu.memory_space<vmem>>, vector<8x784xbf16>
    tpu.vector_store %arg11[%c0_28, %c0_29], %43 {strides = array<i32>} : memref<8x784xbf16, #tpu.memory_space<vmem>>, vector<8x784xbf16>,
    %c0_30 = arith.constant 0 : index
    %c0_31 = arith.constant 0 : index
    %45 = vector.load %arg12[%c0_30, %c0_31] : memref<8x256xf32, #tpu.memory_space<vmem>>, vector<8x256xf32>
    tpu.vector_store %arg12[%c0_30, %c0_31], %13 {strides = array<i32>} : memref<8x256xf32, #tpu.memory_space<vmem>>, vector<8x256xf32>,
    return
  }
  func.func @transform_0(%arg0: i32) -> (i32, i32) {
    %c0_i32 = arith.constant 0 : i32
    %c0_i32_0 = arith.constant 0 : i32
    return %arg0, %c0_i32 : i32, i32
  }
  func.func @transform_1(%arg0: i32) -> (i32, i32) {
    %c0_i32 = arith.constant 0 : i32
    %c0_i32_0 = arith.constant 0 : i32
    %c0_i32_1 = arith.constant 0 : i32
    return %c0_i32, %c0_i32_0 : i32, i32
  }
  func.func @transform_2(%arg0: i32) -> (i32, i32) {
    %c0_i32 = arith.constant 0 : i32
    %c0_i32_0 = arith.constant 0 : i32
    %c0_i32_1 = arith.constant 0 : i32
    return %c0_i32, %c0_i32_0 : i32, i32
  }
  func.func @transform_3(%arg0: i32) -> (i32, i32) {
    %c0_i32 = arith.constant 0 : i32
    %c0_i32_0 = arith.constant 0 : i32
    %c0_i32_1 = arith.constant 0 : i32
    return %c0_i32, %c0_i32_0 : i32, i32
  }
  func.func @transform_4(%arg0: i32) -> (i32, i32) {
    %c0_i32 = arith.constant 0 : i32
    %c0_i32_0 = arith.constant 0 : i32
    %c0_i32_1 = arith.constant 0 : i32
    return %c0_i32, %c0_i32_0 : i32, i32
  }
  func.func @transform_5(%arg0: i32) -> (i32, i32) {
    %c0_i32 = arith.constant 0 : i32
    %c0_i32_0 = arith.constant 0 : i32
    %c0_i32_1 = arith.constant 0 : i32
    return %c0_i32, %c0_i32_0 : i32, i32
  }
  func.func @transform_6(%arg0: i32) -> (i32, i32) {
    %c0_i32 = arith.constant 0 : i32
    %c0_i32_0 = arith.constant 0 : i32
    %c0_i32_1 = arith.constant 0 : i32
    return %c0_i32, %c0_i32_0 : i32, i32
  }
  func.func @transform_7(%arg0: i32) -> (i32, i32) {
    %c0_i32 = arith.constant 0 : i32
    %c0_i32_0 = arith.constant 0 : i32
    %c0_i32_1 = arith.constant 0 : i32
    return %c0_i32, %c0_i32_0 : i32, i32
  }
  func.func @transform_8(%arg0: i32) -> (i32, i32) {
    %c0_i32 = arith.constant 0 : i32
    %c0_i32_0 = arith.constant 0 : i32
    %c0_i32_1 = arith.constant 0 : i32
    return %c0_i32, %c0_i32_0 : i32, i32
  }
  func.func @transform_9(%arg0: i32) -> (i32, i32) {
    %c0_i32 = arith.constant 0 : i32
    %c0_i32_0 = arith.constant 0 : i32
    return %arg0, %c0_i32 : i32, i32
  }
  func.func @transform_10(%arg0: i32) -> (i32, i32) {
    %c0_i32 = arith.constant 0 : i32
    %c0_i32_0 = arith.constant 0 : i32
    return %arg0, %c0_i32 : i32, i32
  }
  func.func @transform_11(%arg0: i32) -> (i32, i32) {
    %c0_i32 = arith.constant 0 : i32
    %c0_i32_0 = arith.constant 0 : i32
    return %arg0, %c0_i32 : i32, i32
  }
}

</mosaic_0001>

<bundles_post_ra>
// kernel: vae_forward.1
= control target key start
LH: loop header
LB: loop body
LE: loop exit
PB: predicated region body
PF: predicated region fallthrough
CT: control target
= control target key end

     0   :  { %vm1264_vm0 = vcmask 130048   ;;  %vm3838_vm1 = vcmask 125952   ;;  %s6621_s1 = inlined_call_operand.vmem [shape: bf16[784,400], index: 1, kind: input, shape index: {}]   ;;  %s6622_s0 = inlined_call_operand.vmem [shape: bf16[8,784], index: 0, kind: input, shape index: {}]   ;;  %s6623_s3 = inlined_call_operand.vmem [shape: bf16[400,256], index: 3, kind: input, shape index: {}]   ;;  %s6624_s2 = inlined_call_operand.vmem [shape: f32[1,400], index: 2, kind: input, shape index: {}]   ;;  %s6625_s5 = inlined_call_operand.vmem [shape: bf16[128,400], index: 5, kind: input, shape index: {}]   ;;  %s6626_s7 = inlined_call_operand.vmem [shape: bf16[400,784], index: 7, kind: input, shape index: {}]   ;;  %s6627_s4 = inlined_call_operand.vmem [shape: f32[1,256], index: 4, kind: input, shape index: {}]   ;;  %s6628_s11 = inlined_call_operand.vmem [shape: f32[8,256], index: 11, kind: output, shape index: {1}]   ;;  %s6629_s9 = inlined_call_operand.vmem [shape: f32[8,128], index: 9, kind: input, shape index: {}]   ;;  %s6630_s6 = inlined_call_operand.vmem [shape: f32[1,400], index: 6, kind: input, shape index: {}]   ;;  %s6631_s8 = inlined_call_operand.vmem [shape: f32[1,784], index: 8, kind: input, shape index: {}]   ;;  %s6632_s10 = inlined_call_operand.vmem [shape: bf16[8,784], index: 10, kind: output, shape index: {0}]  }
   0x1   :  { %v4348_v0 = vld [vmem:[%s6621_s1 + $0xe4] ss:$16 sps:$4 sm:$0xff]   ;;  %v4352_v2 = vld [vmem:[%s6621_s1 + $0xe0] ss:$16 sps:$4 sm:$0xff]   ;;  %v39_v50 = vld [vmem:[%s6622_s0 + $0x8] sm:$0xff] }
   0x2   :  { %v4350_v1 = vld [vmem:[%s6621_s1 + $0x2e4] ss:$16 sps:$4 sm:$0xff]   ;;  %1268 = vmatprep.subr.bf16.mxu0 %v4348_v0  ;;  %v4353_v3 = vld [vmem:[%s6621_s1 + $0x2e0] ss:$16 sps:$4 sm:$0xff]   ;;  %v5254_v52 = vcombine.high %v39_v50, %v39_v50 }
   0x3   :  { %1309 = vmatprep.subr.bf16.mxu1 %v4350_v1  ;;  %v4354_v4 = vld [vmem:[%s6621_s1 + $0xc4] ss:$16 sps:$4 sm:$0xff]   ;;  %1269 = vmatpush1.bf16.msra.mxu0 %v4352_v2  ;;  %v4358_v6 = vld [vmem:[%s6621_s1 + $0xc0] ss:$16 sps:$4 sm:$0xff]  }
   0x4   :  { %1310 = vmatpush1.bf16.msra.mxu1 %v4353_v3  ;;  %v4356_v5 = vld [vmem:[%s6621_s1 + $0x2c4] ss:$16 sps:$4 sm:$0xff]   ;;  %1270 = vmatprep.subr.bf16.mxu0 %v4354_v4  ;;  %v4359_v7 = vld [vmem:[%s6621_s1 + $0x2c0] ss:$16 sps:$4 sm:$0xff]  }
   0x5   :  { %1311 = vmatprep.subr.bf16.mxu1 %v4356_v5  ;;  %v4360_v8 = vld [vmem:[%s6621_s1 + $0xa4] ss:$16 sps:$4 sm:$0xff]   ;;  %v4364_v10 = vld [vmem:[%s6621_s1 + $0xa0] ss:$16 sps:$4 sm:$0xff]   ;;  %1341 = vmatprep.mubr.bf16.mxu1 %v5254_v52 }
   0x6   :  { %v4362_v9 = vld [vmem:[%s6621_s1 + $0x2a4] ss:$16 sps:$4 sm:$0xff]   ;;  %v4365_v11 = vld [vmem:[%s6621_s1 + $0x2a0] ss:$16 sps:$4 sm:$0xff]  }
   0x7   :  { %1271 = vmatpush1.bf16.msra.mxu0 %v4358_v6  ;;  %v4366_v12 = vld [vmem:[%s6621_s1 + $0x84] ss:$16 sps:$4 sm:$0xff]   ;;  %v4370_v14 = vld [vmem:[%s6621_s1 + $0x80] ss:$16 sps:$4 sm:$0xff]  }
   0x8   :  { %1312 = vmatpush1.bf16.msra.mxu1 %v4359_v7  ;;  %1272 = vmatprep.subr.bf16.mxu0 %v4360_v8  ;;  %v4368_v13 = vld [vmem:[%s6621_s1 + $0x284] ss:$16 sps:$4 sm:$0xff]   ;;  %v4371_v15 = vld [vmem:[%s6621_s1 + $0x280] ss:$16 sps:$4 sm:$0xff]   ;;  %v5311_v7 = vcombine.low %v39_v50, %v39_v50  ;;  %v4506_v50 = vld [vmem:[%s6621_s1 + $0x1e8] ss:$16 sps:$4 sm:$0xff]  }
   0x9   :  { %1313 = vmatprep.subr.bf16.mxu1 %v4362_v9  ;;  %v4372_v16 = vld [vmem:[%s6621_s1 + $0x64] ss:$16 sps:$4 sm:$0xff]   ;;  %v4376_v18 = vld [vmem:[%s6621_s1 + $0x60] ss:$16 sps:$4 sm:$0xff]  }
   0xa   :  { %v4374_v17 = vld [vmem:[%s6621_s1 + $0x264] ss:$16 sps:$4 sm:$0xff]   ;;  %v4377_v19 = vld [vmem:[%s6621_s1 + $0x260] ss:$16 sps:$4 sm:$0xff]  }
   0xb   :  { %1273 = vmatpush1.bf16.msra.mxu0 %v4364_v10  ;;  %v4378_v20 = vld [vmem:[%s6621_s1 + $0x44] ss:$16 sps:$4 sm:$0xff]   ;;  %v4382_v22 = vld [vmem:[%s6621_s1 + $0x40] ss:$16 sps:$4 sm:$0xff]  }
   0xc   :  { %1314 = vmatpush1.bf16.msra.mxu1 %v4365_v11  ;;  %1274 = vmatprep.subr.bf16.mxu0 %v4366_v12  ;;  %v4380_v21 = vld [vmem:[%s6621_s1 + $0x244] ss:$16 sps:$4 sm:$0xff]   ;;  %v4383_v23 = vld [vmem:[%s6621_s1 + $0x240] ss:$16 sps:$4 sm:$0xff]   ;;  %v4460_v11 = vld [vmem:[%s6621_s1 + $0xec] ss:$16 sps:$4 sm:$0xff]  }
   0xd   :  { %1315 = vmatprep.subr.bf16.mxu1 %v4368_v13  ;;  %v4384_v24 = vld [vmem:[%s6621_s1 + $0x24] ss:$16 sps:$4 sm:$0xff]   ;;  %v4388_v26 = vld [vmem:[%s6621_s1 + $0x20] ss:$16 sps:$4 sm:$0xff]   ;;  %v5038_v13 = vmov 0  }
   0xe   :  { %v4386_v25 = vld [vmem:[%s6621_s1 + $0x224] ss:$16 sps:$4 sm:$0xff]   ;;  %v4389_v27 = vld [vmem:[%s6621_s1 + $0x220] ss:$16 sps:$4 sm:$0xff]  }
   0xf   :  { %1275 = vmatpush1.bf16.msra.mxu0 %v4370_v14  ;;  %v4390_v28 = vld [vmem:[%s6621_s1 + $0x4] ss:$16 sps:$4 sm:$0xff]   ;;  %v4394_v30 = vld [vmem:[%s6621_s1] ss:$16 sps:$4 sm:$0xff]  }
  0x10   :  { %1316 = vmatpush1.bf16.msra.mxu1 %v4371_v15  ;;  %1276 = vmatprep.subr.bf16.mxu0 %v4372_v16  ;;  %v4392_v29 = vld [vmem:[%s6621_s1 + $0x204] ss:$16 sps:$4 sm:$0xff]   ;;  %v4395_v31 = vld [vmem:[%s6621_s1 + $0x200] ss:$16 sps:$4 sm:$0xff]   ;;  %v5337_v15 = vld [vmem:[%s6622_s0 + $0x18] ss:$0 sps:$4 sm:$0xff]  }
  0x11   :  { %1317 = vmatprep.subr.bf16.mxu1 %v4374_v17  ;;  %v4396_v32 = vld [vmem:[%s6621_s1 + $0x1e4] ss:$16 sps:$4 sm:$0xff]   ;;  %v4400_v34 = vld [vmem:[%s6621_s1 + $0x1e0] ss:$16 sps:$4 sm:$0xff]   ;;  %v4458_v16 = vld [vmem:[%s6621_s1 + $0xe8] ss:$16 sps:$4 sm:$0xff]  }
  0x12   :  { %v4398_v33 = vld [vmem:[%s6621_s1 + $0x3e4] ss:$16 sps:$4 sm:$0xff]   ;;  %v4401_v35 = vld [vmem:[%s6621_s1 + $0x3e0] ss:$16 sps:$4 sm:$0xff]  }
  0x13   :  { %1277 = vmatpush1.bf16.msra.mxu0 %v4376_v18  ;;  %v4402_v36 = vld [vmem:[%s6621_s1 + $0x1c4] ss:$16 sps:$4 sm:$0xff]   ;;  %v4406_v38 = vld [vmem:[%s6621_s1 + $0x1c0] ss:$16 sps:$4 sm:$0xff]   ;;  %v4466_v18 = vld [vmem:[%s6621_s1 + $0xcc] ss:$16 sps:$4 sm:$0xff]  }
  0x14   :  { %1318 = vmatpush1.bf16.msra.mxu1 %v4377_v19  ;;  %1278 = vmatprep.subr.bf16.mxu0 %v4378_v20  ;;  %v4404_v37 = vld [vmem:[%s6621_s1 + $0x3c4] ss:$16 sps:$4 sm:$0xff]   ;;  %v4407_v39 = vld [vmem:[%s6621_s1 + $0x3c0] ss:$16 sps:$4 sm:$0xff]   ;;  %v4464_v20 = vld [vmem:[%s6621_s1 + $0xc8] ss:$16 sps:$4 sm:$0xff]  }
  0x15   :  { %1319 = vmatprep.subr.bf16.mxu1 %v4380_v21  ;;  %v4408_v40 = vld [vmem:[%s6621_s1 + $0x1a4] ss:$16 sps:$4 sm:$0xff]   ;;  %v4412_v42 = vld [vmem:[%s6621_s1 + $0x1a0] ss:$16 sps:$4 sm:$0xff]  }
  0x16   :  { %v4410_v41 = vld [vmem:[%s6621_s1 + $0x3a4] ss:$16 sps:$4 sm:$0xff]   ;;  %v4413_v43 = vld [vmem:[%s6621_s1 + $0x3a0] ss:$16 sps:$4 sm:$0xff]  }
  0x17   :  { %1279 = vmatpush1.bf16.msra.mxu0 %v4382_v22  ;;  %v4414_v44 = vld [vmem:[%s6621_s1 + $0x184] ss:$16 sps:$4 sm:$0xff]   ;;  %v4418_v46 = vld [vmem:[%s6621_s1 + $0x180] ss:$16 sps:$4 sm:$0xff]   ;;  %v4472_v22 = vld [vmem:[%s6621_s1 + $0xac] ss:$16 sps:$4 sm:$0xff]  }
  0x18   :  { %1320 = vmatpush1.bf16.msra.mxu1 %v4383_v23  ;;  %1280 = vmatprep.subr.bf16.mxu0 %v4384_v24  ;;  %v4416_v45 = vld [vmem:[%s6621_s1 + $0x384] ss:$16 sps:$4 sm:$0xff]   ;;  %v4419_v48 = vld [vmem:[%s6621_s1 + $0x380] ss:$16 sps:$4 sm:$0xff]   ;;  %v4470_v24 = vld [vmem:[%s6621_s1 + $0xa8] ss:$16 sps:$4 sm:$0xff]  }
  0x19   :  { %1321 = vmatprep.subr.bf16.mxu1 %v4386_v25  ;;  %v38_v47 = vld [vmem:[%s6622_s0] sm:$0xff] }
  0x1a   :  { %v5246_v49 = vcombine.high %v38_v47, %v38_v47  ;;  %v4420_v51 = vld [vmem:[%s6621_s1 + $0x164] ss:$16 sps:$4 sm:$0xff]   ;;  %v4424_v54 = vld [vmem:[%s6621_s1 + $0x160] ss:$16 sps:$4 sm:$0xff]   ;;  %v5309_v6 = vcombine.low %v38_v47, %v38_v47 }
  0x1b   :  { %1281 = vmatpush1.bf16.msra.mxu0 %v4388_v26  ;;  %v4422_v53 = vld [vmem:[%s6621_s1 + $0x364] ss:$16 sps:$4 sm:$0xff]   ;;  %v4425_v55 = vld [vmem:[%s6621_s1 + $0x360] ss:$16 sps:$4 sm:$0xff]   ;;  %v4478_v26 = vld [vmem:[%s6621_s1 + $0x8c] ss:$16 sps:$4 sm:$0xff]  }
  0x1c   :  { %1322 = vmatpush1.bf16.msra.mxu1 %v4389_v27  ;;  %1282 = vmatprep.subr.bf16.mxu0 %v4390_v28  ;;  %v4426_v56 = vld [vmem:[%s6621_s1 + $0x144] ss:$16 sps:$4 sm:$0xff]   ;;  %v4430_v58 = vld [vmem:[%s6621_s1 + $0x140] ss:$16 sps:$4 sm:$0xff]   ;;  %v4476_v28 = vld [vmem:[%s6621_s1 + $0x88] ss:$16 sps:$4 sm:$0xff]  }
  0x1d   :  { %1323 = vmatprep.subr.bf16.mxu1 %v4392_v29  ;;  %1300 = vmatprep.mubr.bf16.mxu0 %v5246_v49  ;;  %v4428_v57 = vld [vmem:[%s6621_s1 + $0x344] ss:$16 sps:$4 sm:$0xff]   ;;  %v4431_v59 = vld [vmem:[%s6621_s1 + $0x340] ss:$16 sps:$4 sm:$0xff]  }
  0x1e   :  { %v4432_v60 = vld [vmem:[%s6621_s1 + $0x124] ss:$16 sps:$4 sm:$0xff]   ;;  %v4436_v62 = vld [vmem:[%s6621_s1 + $0x120] ss:$16 sps:$4 sm:$0xff]  }
  0x1f   :  { %1283 = vmatpush1.bf16.msra.mxu0 %v4394_v30  ;;  %v4434_v61 = vld [vmem:[%s6621_s1 + $0x324] ss:$16 sps:$4 sm:$0xff]   ;;  %v4437_v63 = vld [vmem:[%s6621_s1 + $0x320] ss:$16 sps:$4 sm:$0xff]   ;;  %v4484_v30 = vld [vmem:[%s6621_s1 + $0x6c] ss:$16 sps:$4 sm:$0xff]  }
  0x20   :  { %1324 = vmatpush1.bf16.msra.mxu1 %v4395_v31  ;;  %1284 = vmatprep.subr.bf16.mxu0 %v4396_v32  ;;  %v4438_v0 = vld [vmem:[%s6621_s1 + $0x104] ss:$16 sps:$4 sm:$0xff]   ;;  %v4442_v2 = vld [vmem:[%s6621_s1 + $0x100] ss:$16 sps:$4 sm:$0xff]  }
  0x21   :  { %1325 = vmatprep.subr.bf16.mxu1 %v4398_v33  ;;  %v4440_v1 = vld [vmem:[%s6621_s1 + $0x304] ss:$16 sps:$4 sm:$0xff]   ;;  %v4443_v3 = vld [vmem:[%s6621_s1 + $0x300] ss:$16 sps:$4 sm:$0xff]  }
  0x22   :  { %v4451_v4 = vld [vmem:[%s6621_s1 + $0x4e4] ss:$16 sps:$4 sm:$0xff]   ;;  %v4449_v8 = vld [vmem:[%s6621_s1 + $0x4e0] ss:$16 sps:$4 sm:$0xff]  }
  0x23   :  { %1285 = vmatpush2.bf16.msra.mxu0 %v4400_v34  ;;  %v4454_v5 = vld [vmem:[%s6621_s1 + $0x604] ss:$16 sps:$4 sm:$0xff]   ;;  %v4452_v9 = vld [vmem:[%s6621_s1 + $0x600] ss:$16 sps:$4 sm:$0xff]   ;;  %v4482_v34 = vld [vmem:[%s6621_s1 + $0x68] ss:$16 sps:$4 sm:$0xff]  }
  0x24   :  { %1326 = vmatpush2.bf16.msra.mxu1 %v4401_v35  ;;  %1286 = vmatprep.subr.bf16.mxu0 %v4402_v36  ;;  %v4457_v10 = vld [vmem:[%s6621_s1 + $0x4c4] ss:$16 sps:$4 sm:$0xff]   ;;  %v4455_v12 = vld [vmem:[%s6621_s1 + $0x4c0] ss:$16 sps:$4 sm:$0xff]   ;;  %v4490_v36 = vld [vmem:[%s6621_s1 + $0x4c] ss:$16 sps:$4 sm:$0xff]  }
  0x25   :  { %1327 = vmatprep.subr.bf16.mxu1 %v4404_v37  ;;  %v4463_v14 = vld [vmem:[%s6621_s1 + $0x4a4] ss:$16 sps:$4 sm:$0xff]   ;;  %v4461_v17 = vld [vmem:[%s6621_s1 + $0x4a0] ss:$16 sps:$4 sm:$0xff]  }
  0x26   :  { %v4469_v19 = vld [vmem:[%s6621_s1 + $0x484] ss:$16 sps:$4 sm:$0xff]   ;;  %v4467_v21 = vld [vmem:[%s6621_s1 + $0x480] ss:$16 sps:$4 sm:$0xff]  }
  0x27   :  { %1287 = vmatpush2.bf16.msra.mxu0 %v4406_v38  ;;  %v4475_v23 = vld [vmem:[%s6621_s1 + $0x464] ss:$16 sps:$4 sm:$0xff]   ;;  %v4473_v25 = vld [vmem:[%s6621_s1 + $0x460] ss:$16 sps:$4 sm:$0xff]   ;;  %v4488_v38 = vld [vmem:[%s6621_s1 + $0x48] ss:$16 sps:$4 sm:$0xff]  }
  0x28   :  { %1328 = vmatpush2.bf16.msra.mxu1 %v4407_v39  ;;  %1288 = vmatprep.subr.bf16.mxu0 %v4408_v40  ;;  %v4481_v27 = vld [vmem:[%s6621_s1 + $0x444] ss:$16 sps:$4 sm:$0xff]   ;;  %v4479_v29 = vld [vmem:[%s6621_s1 + $0x440] ss:$16 sps:$4 sm:$0xff]   ;;  %v4496_v40 = vld [vmem:[%s6621_s1 + $0x2c] ss:$16 sps:$4 sm:$0xff]  }
  0x29   :  { %1329 = vmatprep.subr.bf16.mxu1 %v4410_v41  ;;  %v4487_v31 = vld [vmem:[%s6621_s1 + $0x424] ss:$16 sps:$4 sm:$0xff]   ;;  %v4485_v35 = vld [vmem:[%s6621_s1 + $0x420] ss:$16 sps:$4 sm:$0xff]  }
  0x2a   :  { %v5393_v32 = vld [vmem:[%s6622_s0 + $0x10] sm:$0xff] }
  0x2b   :  { %1289 = vmatpush2.bf16.msra.mxu0 %v4412_v42  ;;  %v5397_v33 = vcombine.high %v5393_v32, %v5393_v32  ;;  %v4493_v37 = vld [vmem:[%s6621_s1 + $0x404] ss:$16 sps:$4 sm:$0xff]   ;;  %v4491_v39 = vld [vmem:[%s6621_s1 + $0x400] ss:$16 sps:$4 sm:$0xff]   ;;  %v4494_v42 = vld [vmem:[%s6621_s1 + $0x28] ss:$16 sps:$4 sm:$0xff]  }
  0x2c   :  { %1330 = vmatpush2.bf16.msra.mxu1 %v4413_v43  ;;  %1290 = vmatprep.subr.bf16.mxu0 %v4414_v44  ;;  %v4499_v41 = vld [vmem:[%s6621_s1 + $0x5e4] ss:$16 sps:$4 sm:$0xff]   ;;  %v4497_v43 = vld [vmem:[%s6621_s1 + $0x5e0] ss:$16 sps:$4 sm:$0xff]   ;;  %v4502_v44 = vld [vmem:[%s6621_s1 + $0xc] ss:$16 sps:$4 sm:$0xff]  }
  0x2d   :  { %1331 = vmatprep.subr.bf16.mxu1 %v4416_v45  ;;  %v4505_v45 = vld [vmem:[%s6621_s1 + $0x5c4] ss:$16 sps:$4 sm:$0xff]   ;;  %v4503_v47 = vld [vmem:[%s6621_s1 + $0x5c0] ss:$16 sps:$4 sm:$0xff]  }
  0x2f   :  { %1291 = vmatpush2.bf16.msra.mxu0 %v4418_v46  ;;  %v4500_v46 = vld [vmem:[%s6621_s1 + $0x8] ss:$16 sps:$4 sm:$0xff]  }
  0x30   :  { %1332 = vmatpush2.bf16.msra.mxu1 %v4419_v48  ;;  %1292 = vmatprep.subr.bf16.mxu0 %v4420_v51  ;;  %v4508_v48 = vld [vmem:[%s6621_s1 + $0x1ec] ss:$16 sps:$4 sm:$0xff]   ;;  %v4509_v51 = vld [vmem:[%s6621_s1 + $0x5a0] ss:$16 sps:$4 sm:$0xff]  }
  0x31   :  { %1333 = vmatprep.subr.bf16.mxu1 %v4422_v53  ;;  %v4514_v53 = vld [vmem:[%s6621_s1 + $0x1cc] ss:$16 sps:$4 sm:$0xff]  }
  0x33   :  { %1293 = vmatpush2.bf16.msra.mxu0 %v4424_v54  ;;  %v4517_v54 = vld [vmem:[%s6621_s1 + $0x584] ss:$16 sps:$4 sm:$0xff]  }
  0x34   :  { %1334 = vmatpush2.bf16.msra.mxu1 %v4425_v55  ;;  %1294 = vmatprep.subr.bf16.mxu0 %v4426_v56  ;;  %v4512_v55 = vld [vmem:[%s6621_s1 + $0x1c8] ss:$16 sps:$4 sm:$0xff]   ;;  %v4515_v56 = vld [vmem:[%s6621_s1 + $0x580] ss:$16 sps:$4 sm:$0xff]  }
  0x35   :  { %1335 = vmatprep.subr.bf16.mxu1 %v4428_v57  ;;  %v4520_v57 = vld [vmem:[%s6621_s1 + $0x1ac] ss:$16 sps:$4 sm:$0xff]  }
  0x37   :  { %1295 = vmatpush2.bf16.msra.mxu0 %v4430_v58  ;;  %v4523_v58 = vld [vmem:[%s6621_s1 + $0x564] ss:$16 sps:$4 sm:$0xff]  }
  0x38   :  { %1336 = vmatpush2.bf16.msra.mxu1 %v4431_v59  ;;  %1296 = vmatprep.subr.bf16.mxu0 %v4432_v60  ;;  %v4518_v59 = vld [vmem:[%s6621_s1 + $0x1a8] ss:$16 sps:$4 sm:$0xff]   ;;  %v4521_v60 = vld [vmem:[%s6621_s1 + $0x560] ss:$16 sps:$4 sm:$0xff]  }
  0x39   :  { %1337 = vmatprep.subr.bf16.mxu1 %v4434_v61  ;;  %v4526_v61 = vld [vmem:[%s6621_s1 + $0x18c] ss:$16 sps:$4 sm:$0xff]  }
  0x3b   :  { %1297 = vmatpush2.bf16.msra.mxu0 %v4436_v62  ;;  %v4529_v62 = vld [vmem:[%s6621_s1 + $0x544] ss:$16 sps:$4 sm:$0xff]  }
  0x3c   :  { %1338 = vmatpush2.bf16.msra.mxu1 %v4437_v63  ;;  %1298 = vmatprep.subr.bf16.mxu0 %v4438_v0  ;;  %v4524_v63 = vld [vmem:[%s6621_s1 + $0x188] ss:$16 sps:$4 sm:$0xff]   ;;  %v4527_v0 = vld [vmem:[%s6621_s1 + $0x540] ss:$16 sps:$4 sm:$0xff]  }
  0x3d   :  { %1339 = vmatprep.subr.bf16.mxu1 %v4440_v1  ;;  %v4532_v1 = vld [vmem:[%s6621_s1 + $0x16c] ss:$16 sps:$4 sm:$0xff]  }
  0x3f   :  { %1299 = vmatpush2.bf16.msra.mxu0 %v4442_v2  ;;  %v4535_v2 = vld [vmem:[%s6621_s1 + $0x524] ss:$16 sps:$4 sm:$0xff]  }
  0x40   :  { %1340 = vmatpush2.bf16.msra.mxu1 %v4443_v3  ;;  %1350 = vmatprep.subr.bf16.mxu0 %v4451_v4  ;;  %v4530_v3 = vld [vmem:[%s6621_s1 + $0x168] ss:$16 sps:$4 sm:$0xff]   ;;  %v4533_v4 = vld [vmem:[%s6621_s1 + $0x520] ss:$16 sps:$4 sm:$0xff]  }
  0x41   :  { %1405 = vmatprep.subr.bf16.mxu1 %v4454_v5  ;;  %v4538_v5 = vld [vmem:[%s6621_s1 + $0x14c] ss:$16 sps:$4 sm:$0xff]  }
  0x42   :  { %1301 = vmatmul.mubr.bf16.vlgmr.msra.gmra.mxu0 %v5309_v6 }
  0x43   :  { %1342 = vmatmul.mubr.bf16.vlgmr.msra.gmra.mxu1 %v5311_v7  ;;  %1351 = vmatpush1.bf16.msra.mxu0 %v4449_v8  ;;  %v4541_v8 = vld [vmem:[%s6621_s1 + $0x504] ss:$16 sps:$4 sm:$0xff]  }
  0x44   :  { %1406 = vmatpush1.bf16.msra.mxu1 %v4452_v9  ;;  %1352 = vmatprep.subr.bf16.mxu0 %v4457_v10  ;;  %v4536_v9 = vld [vmem:[%s6621_s1 + $0x148] ss:$16 sps:$4 sm:$0xff]   ;;  %v4539_v10 = vld [vmem:[%s6621_s1 + $0x500] ss:$16 sps:$4 sm:$0xff]  }
  0x45   :  { %1423 = vmatprep.mubr.bf16.mxu1 %v5038_v13  ;;  %1432 = vmatprep.subr.bf16.mxu1 %v4460_v11  ;;  %v4546_v11 = vld [vmem:[%s6621_s1 + $0x12c] ss:$16 sps:$4 sm:$0xff]  }
  0x46   :  { %1382 = vmatprep.mubr.bf16.mxu0 %v5397_v33 }
  0x47   :  { %1353 = vmatpush1.bf16.msra.mxu0 %v4455_v12  ;;  %v4549_v12 = vld [vmem:[%s6621_s1 + $0x2ec] ss:$16 sps:$4 sm:$0xff]  }
  0x48   :  { %1354 = vmatprep.subr.bf16.mxu0 %v4463_v14  ;;  %v5522_v14 = vcombine.low %v5393_v32, %v5393_v32  ;;  %v4576_v32 = vld [vmem:[%s6621_s1 + $0x48c] ss:$16 sps:$4 sm:$0xff]  }
  0x4b   :  { %4053 = vmatmul.mubr.msk.bf16.vlgmr.msra.gmra.mxu1 %vm1264_vm0, %v5337_v15  ;;  %1355 = vmatpush1.bf16.msra.mxu0 %v4461_v17  ;;  %v4547_v17 = vld [vmem:[%s6621_s1 + $0x2e8] ss:$16 sps:$4 sm:$0xff]  }
  0x4c   :  { %1433 = vmatpush1.bf16.msra.mxu1 %v4458_v16  ;;  %1356 = vmatprep.subr.bf16.mxu0 %v4469_v19  ;;  %v4544_v16 = vld [vmem:[%s6621_s1 + $0x128] ss:$16 sps:$4 sm:$0xff]   ;;  %v4555_v19 = vld [vmem:[%s6621_s1 + $0x2cc] ss:$16 sps:$4 sm:$0xff]  }
  0x4d   :  { %1434 = vmatprep.subr.bf16.mxu1 %v4466_v18  ;;  %1464 = vmatprep.mubr.bf16.mxu1 %v5246_v49  ;;  %v4511_v49 = vld [vmem:[%s6621_s1 + $0x5a4] ss:$16 sps:$4 sm:$0xff]   ;;  %v4552_v18 = vld [vmem:[%s6621_s1 + $0x10c] ss:$16 sps:$4 sm:$0xff]  }
  0x4f   :  { %1357 = vmatpush1.bf16.msra.mxu0 %v4467_v21  ;;  %v4553_v21 = vld [vmem:[%s6621_s1 + $0x2c8] ss:$16 sps:$4 sm:$0xff]  }
  0x50   :  { %1435 = vmatpush1.bf16.msra.mxu1 %v4464_v20  ;;  %1358 = vmatprep.subr.bf16.mxu0 %v4475_v23  ;;  %v4550_v20 = vld [vmem:[%s6621_s1 + $0x108] ss:$16 sps:$4 sm:$0xff]   ;;  %v4561_v23 = vld [vmem:[%s6621_s1 + $0x2ac] ss:$16 sps:$4 sm:$0xff]  }
  0x51   :  { %1436 = vmatprep.subr.bf16.mxu1 %v4472_v22  ;;  %v4558_v22 = vld [vmem:[%s6621_s1 + $0x4ec] ss:$16 sps:$4 sm:$0xff]  }
  0x53   :  { %1359 = vmatpush1.bf16.msra.mxu0 %v4473_v25  ;;  %v4559_v25 = vld [vmem:[%s6621_s1 + $0x2a8] ss:$16 sps:$4 sm:$0xff]  }
  0x54   :  { %1437 = vmatpush1.bf16.msra.mxu1 %v4470_v24  ;;  %1360 = vmatprep.subr.bf16.mxu0 %v4481_v27  ;;  %v4556_v24 = vld [vmem:[%s6621_s1 + $0x4e8] ss:$16 sps:$4 sm:$0xff]  }
  0x55   :  { %1438 = vmatprep.subr.bf16.mxu1 %v4478_v26  ;;  %v4564_v26 = vld [vmem:[%s6621_s1 + $0x4cc] ss:$16 sps:$4 sm:$0xff]   ;;  %v4562_v27 = vld [vmem:[%s6621_s1 + $0x4c8] ss:$16 sps:$4 sm:$0xff]  }
  0x57   :  { %1361 = vmatpush1.bf16.msra.mxu0 %v4479_v29  ;;  %v4570_v29 = vld [vmem:[%s6621_s1 + $0x4ac] ss:$16 sps:$4 sm:$0xff]  }
  0x58   :  { %1439 = vmatpush1.bf16.msra.mxu1 %v4476_v28  ;;  %1362 = vmatprep.subr.bf16.mxu0 %v4487_v31  ;;  %v4565_v28 = vld [vmem:[%s6621_s1 + $0x288] ss:$16 sps:$4 sm:$0xff]  }
  0x59   :  { %1440 = vmatprep.subr.bf16.mxu1 %v4484_v30  ;;  %v4568_v30 = vld [vmem:[%s6621_s1 + $0x4a8] ss:$16 sps:$4 sm:$0xff]  }
  0x5a   :  { %v4571_v31 = vld [vmem:[%s6621_s1 + $0x268] ss:$16 sps:$4 sm:$0xff]  }
  0x5b   :  { %1363 = vmatpush1.bf16.msra.mxu0 %v4485_v35  ;;  %v4577_v35 = vld [vmem:[%s6621_s1 + $0x248] ss:$16 sps:$4 sm:$0xff]  }
  0x5c   :  { %1441 = vmatpush1.bf16.msra.mxu1 %v4482_v34  ;;  %1364 = vmatprep.subr.bf16.mxu0 %v4493_v37  ;;  %v4579_v34 = vld [vmem:[%s6621_s1 + $0x24c] ss:$16 sps:$4 sm:$0xff]  }
  0x5d   :  { %1442 = vmatprep.subr.bf16.mxu1 %v4490_v36  ;;  %v4582_v36 = vld [vmem:[%s6621_s1 + $0x46c] ss:$16 sps:$4 sm:$0xff]  }
  0x5e   :  { %v4585_v37 = vld [vmem:[%s6621_s1 + $0x22c] ss:$16 sps:$4 sm:$0xff]  }
  0x5f   :  { %1365 = vmatpush1.bf16.msra.mxu0 %v4491_v39  ;;  %v4583_v39 = vld [vmem:[%s6621_s1 + $0x228] ss:$16 sps:$4 sm:$0xff]  }
  0x60   :  { %1443 = vmatpush1.bf16.msra.mxu1 %v4488_v38  ;;  %1366 = vmatprep.subr.bf16.mxu0 %v4499_v41  ;;  %v4580_v38 = vld [vmem:[%s6621_s1 + $0x468] ss:$16 sps:$4 sm:$0xff]   ;;  %v4591_v41 = vld [vmem:[%s6621_s1 + $0x20c] ss:$16 sps:$4 sm:$0xff]  }
  0x61   :  { %1444 = vmatprep.subr.bf16.mxu1 %v4496_v40  ;;  %v4588_v40 = vld [vmem:[%s6621_s1 + $0x44c] ss:$16 sps:$4 sm:$0xff]  }
  0x63   :  { %1367 = vmatpush2.bf16.msra.mxu0 %v4497_v43  ;;  %v4589_v43 = vld [vmem:[%s6621_s1 + $0x208] ss:$16 sps:$4 sm:$0xff]  }
  0x64   :  { %1445 = vmatpush1.bf16.msra.mxu1 %v4494_v42  ;;  %1368 = vmatprep.subr.bf16.mxu0 %v4505_v45  ;;  %v4586_v42 = vld [vmem:[%s6621_s1 + $0x448] ss:$16 sps:$4 sm:$0xff]   ;;  %v4597_v45 = vld [vmem:[%s6621_s1 + $0x3ec] ss:$16 sps:$4 sm:$0xff]  }
  0x65   :  { %1446 = vmatprep.subr.bf16.mxu1 %v4502_v44  ;;  %v4594_v44 = vld [vmem:[%s6621_s1 + $0x42c] ss:$16 sps:$4 sm:$0xff]  }
  0x67   :  { %1369 = vmatpush2.bf16.msra.mxu0 %v4503_v47  ;;  %v4595_v47 = vld [vmem:[%s6621_s1 + $0x3e8] ss:$16 sps:$4 sm:$0xff]  }
  0x68   :  { %1447 = vmatpush1.bf16.msra.mxu1 %v4500_v46  ;;  %1370 = vmatprep.subr.bf16.mxu0 %v4511_v49  ;;  %v4592_v46 = vld [vmem:[%s6621_s1 + $0x428] ss:$16 sps:$4 sm:$0xff]   ;;  %v4603_v49 = vld [vmem:[%s6621_s1 + $0x3cc] ss:$16 sps:$4 sm:$0xff]  }
  0x69   :  { %1448 = vmatprep.subr.bf16.mxu1 %v4508_v48  ;;  %v4600_v48 = vld [vmem:[%s6621_s1 + $0x40c] ss:$16 sps:$4 sm:$0xff]  }
  0x6b   :  { %1371 = vmatpush2.bf16.msra.mxu0 %v4509_v51  ;;  %v4601_v51 = vld [vmem:[%s6621_s1 + $0x3c8] ss:$16 sps:$4 sm:$0xff]  }
  0x6c   :  { %1449 = vmatpush2.bf16.msra.mxu1 %v4506_v50  ;;  %1372 = vmatprep.subr.bf16.mxu0 %v4517_v54  ;;  %v4598_v50 = vld [vmem:[%s6621_s1 + $0x408] ss:$16 sps:$4 sm:$0xff]   ;;  %v4609_v54 = vld [vmem:[%s6621_s1 + $0x3ac] ss:$16 sps:$4 sm:$0xff]  }
  0x6d   :  { %1450 = vmatprep.subr.bf16.mxu1 %v4514_v53  ;;  %v4606_v53 = vld [vmem:[%s6621_s1 + $0x5ec] ss:$16 sps:$4 sm:$0xff]  }
  0x6f   :  { %1373 = vmatpush2.bf16.msra.mxu0 %v4515_v56  ;;  %v4607_v56 = vld [vmem:[%s6621_s1 + $0x3a8] ss:$16 sps:$4 sm:$0xff]  }
  0x70   :  { %1451 = vmatpush2.bf16.msra.mxu1 %v4512_v55  ;;  %1374 = vmatprep.subr.bf16.mxu0 %v4523_v58  ;;  %v4604_v55 = vld [vmem:[%s6621_s1 + $0x5e8] ss:$16 sps:$4 sm:$0xff]   ;;  %v4615_v58 = vld [vmem:[%s6621_s1 + $0x38c] ss:$16 sps:$4 sm:$0xff]  }
  0x71   :  { %1452 = vmatprep.subr.bf16.mxu1 %v4520_v57  ;;  %v4612_v57 = vld [vmem:[%s6621_s1 + $0x5cc] ss:$16 sps:$4 sm:$0xff]  }
  0x73   :  { %1375 = vmatpush2.bf16.msra.mxu0 %v4521_v60  ;;  %v4613_v60 = vld [vmem:[%s6621_s1 + $0x388] ss:$16 sps:$4 sm:$0xff]  }
  0x74   :  { %1453 = vmatpush2.bf16.msra.mxu1 %v4518_v59  ;;  %1376 = vmatprep.subr.bf16.mxu0 %v4529_v62  ;;  %v4610_v59 = vld [vmem:[%s6621_s1 + $0x5c8] ss:$16 sps:$4 sm:$0xff]   ;;  %v4621_v62 = vld [vmem:[%s6621_s1 + $0x36c] ss:$16 sps:$4 sm:$0xff]  }
  0x75   :  { %1454 = vmatprep.subr.bf16.mxu1 %v4526_v61  ;;  %v4618_v61 = vld [vmem:[%s6621_s1 + $0x5ac] ss:$16 sps:$4 sm:$0xff]  }
  0x77   :  { %1377 = vmatpush2.bf16.msra.mxu0 %v4527_v0  ;;  %v4619_v0 = vld [vmem:[%s6621_s1 + $0x368] ss:$16 sps:$4 sm:$0xff]  }
  0x78   :  { %1455 = vmatpush2.bf16.msra.mxu1 %v4524_v63  ;;  %1378 = vmatprep.subr.bf16.mxu0 %v4535_v2  ;;  %v4616_v63 = vld [vmem:[%s6621_s1 + $0x5a8] ss:$16 sps:$4 sm:$0xff]   ;;  %v4627_v2 = vld [vmem:[%s6621_s1 + $0x34c] ss:$16 sps:$4 sm:$0xff]  }
  0x79   :  { %1456 = vmatprep.subr.bf16.mxu1 %v4532_v1  ;;  %v4624_v1 = vld [vmem:[%s6621_s1 + $0x58c] ss:$16 sps:$4 sm:$0xff]  }
  0x7b   :  { %1379 = vmatpush2.bf16.msra.mxu0 %v4533_v4  ;;  %v4625_v4 = vld [vmem:[%s6621_s1 + $0x348] ss:$16 sps:$4 sm:$0xff]  }
  0x7c   :  { %1457 = vmatpush2.bf16.msra.mxu1 %v4530_v3  ;;  %1380 = vmatprep.subr.bf16.mxu0 %v4541_v8  ;;  %v4622_v3 = vld [vmem:[%s6621_s1 + $0x588] ss:$16 sps:$4 sm:$0xff]   ;;  %v4633_v8 = vld [vmem:[%s6621_s1 + $0x32c] ss:$16 sps:$4 sm:$0xff]  }
  0x7d   :  { %1458 = vmatprep.subr.bf16.mxu1 %v4538_v5  ;;  %v4630_v5 = vld [vmem:[%s6621_s1 + $0x56c] ss:$16 sps:$4 sm:$0xff]  }
  0x7f   :  { %1381 = vmatpush2.bf16.msra.mxu0 %v4539_v10  ;;  %v4631_v10 = vld [vmem:[%s6621_s1 + $0x328] ss:$16 sps:$4 sm:$0xff]  }
  0x80   :  { %1459 = vmatpush2.bf16.msra.mxu1 %v4536_v9  ;;  %1473 = vmatprep.subr.bf16.mxu0 %v4549_v12  ;;  %v4628_v9 = vld [vmem:[%s6621_s1 + $0x568] ss:$16 sps:$4 sm:$0xff]   ;;  %v4639_v12 = vld [vmem:[%s6621_s1 + $0x30c] ss:$16 sps:$4 sm:$0xff]  }
  0x81   :  { %1460 = vmatprep.subr.bf16.mxu1 %v4546_v11  ;;  %v4636_v11 = vld [vmem:[%s6621_s1 + $0x54c] ss:$16 sps:$4 sm:$0xff]  }
  0x82   :  { %1383 = vmatmul.mubr.bf16.vlgmr.msra.gmra.mxu0 %v5522_v14 }
  0x83   :  { %1474 = vmatpush1.bf16.msra.mxu0 %v4547_v17  ;;  %1505 = vmatprep.mubr.bf16.mxu0 %v5254_v52  ;;  %v4567_v52 = vld [vmem:[%s6621_s1 + $0x28c] ss:$16 sps:$4 sm:$0xff]   ;;  %v4637_v17 = vld [vmem:[%s6621_s1 + $0x308] ss:$16 sps:$4 sm:$0xff]  }
  0x84   :  { %1461 = vmatpush2.bf16.msra.mxu1 %v4544_v16  ;;  %1475 = vmatprep.subr.bf16.mxu0 %v4555_v19  ;;  %v4634_v16 = vld [vmem:[%s6621_s1 + $0x548] ss:$16 sps:$4 sm:$0xff]   ;;  %v4645_v19 = vld [vmem:[%s6621_s1 + $0x60c] ss:$16 sps:$4 sm:$0xff]  }
  0x85   :  { %1462 = vmatprep.subr.bf16.mxu1 %v4552_v18  ;;  %v4642_v18 = vld [vmem:[%s6621_s1 + $0x52c] ss:$16 sps:$4 sm:$0xff]  }
  0x87   :  { %1476 = vmatpush1.bf16.msra.mxu0 %v4553_v21  ;;  %v4643_v21 = vld [vmem:[%s6621_s1 + $0x608] ss:$16 sps:$4 sm:$0xff]  }
  0x88   :  { %1463 = vmatpush2.bf16.msra.mxu1 %v4550_v20  ;;  %1477 = vmatprep.subr.bf16.mxu0 %v4561_v23  ;;  %v4640_v20 = vld [vmem:[%s6621_s1 + $0x528] ss:$16 sps:$4 sm:$0xff]   ;;  %v4651_v23 = vld [vmem:[%s6623_s3 + $0x74] ss:$8 sps:$4 sm:$0xff]  }
  0x89   :  { %1514 = vmatprep.subr.bf16.mxu1 %v4558_v22  ;;  %v4648_v22 = vld [vmem:[%s6621_s1 + $0x50c] ss:$16 sps:$4 sm:$0xff]  }
  0x8b   :  { %1465 = vmatmul.mubr.bf16.vlgmr.msra.gmra.mxu1 %v5309_v6  ;;  %1478 = vmatpush1.bf16.msra.mxu0 %v4559_v25  ;;  %v4573_v6 = vld [vmem:[%s6621_s1 + $0x26c] ss:$16 sps:$4 sm:$0xff]   ;;  %v4649_v25 = vld [vmem:[%s6623_s3 + $0x70] ss:$8 sps:$4 sm:$0xff]  }
  0x8c   :  { %1515 = vmatpush1.bf16.msra.mxu1 %v4556_v24  ;;  %1479 = vmatprep.subr.bf16.mxu0 %v4567_v52  ;;  %v4646_v24 = vld [vmem:[%s6621_s1 + $0x508] ss:$16 sps:$4 sm:$0xff]   ;;  %v4657_v52 = vld [vmem:[%s6623_s3 + $0x54] ss:$8 sps:$4 sm:$0xff]  }
  0x8d   :  { %1516 = vmatprep.subr.bf16.mxu1 %v4564_v26  ;;  %1546 = vmatprep.mubr.bf16.mxu1 %v5397_v33  ;;  %v4574_v33 = vld [vmem:[%s6621_s1 + $0x488] ss:$16 sps:$4 sm:$0xff]   ;;  %v4654_v26 = vld [vmem:[%s6623_s3 + $0x64] ss:$8 sps:$4 sm:$0xff]  }
  0x8f   :  { %1480 = vmatpush1.bf16.msra.mxu0 %v4565_v28  ;;  %v4699_v28 = vld [vmem:[%s6623_s3 + $0x174] ss:$8 sps:$4 sm:$0xff]  }
  0x90   :  { %1517 = vmatpush1.bf16.msra.mxu1 %v4562_v27  ;;  %1481 = vmatprep.subr.bf16.mxu0 %v4573_v6  ;;  %v4655_v27 = vld [vmem:[%s6623_s3 + $0x50] ss:$8 sps:$4 sm:$0xff]   ;;  %v4658_v6 = vld [vmem:[%s6623_s3 + $0x40] ss:$8 sps:$4 sm:$0xff]  }
  0x91   :  { %1518 = vmatprep.subr.bf16.mxu1 %v4570_v29  ;;  %v4702_v29 = vld [vmem:[%s6623_s3 + $0x164] ss:$8 sps:$4 sm:$0xff]  }
  0x93   :  { %1482 = vmatpush1.bf16.msra.mxu0 %v4571_v31  ;;  %v4663_v31 = vld [vmem:[%s6623_s3 + $0x34] ss:$8 sps:$4 sm:$0xff]  }
  0x94   :  { %1519 = vmatpush1.bf16.msra.mxu1 %v4568_v30  ;;  %1483 = vmatprep.subr.bf16.mxu0 %v4579_v34  ;;  %v4700_v30 = vld [vmem:[%s6623_s3 + $0x160] ss:$8 sps:$4 sm:$0xff]   ;;  %v4661_v34 = vld [vmem:[%s6623_s3 + $0x30] ss:$8 sps:$4 sm:$0xff]  }
  0x95   :  { %1520 = vmatprep.subr.bf16.mxu1 %v4576_v32  ;;  %v4705_v32 = vld [vmem:[%s6623_s3 + $0x154] ss:$8 sps:$4 sm:$0xff]  }
  0x97   :  { %1484 = vmatpush1.bf16.msra.mxu0 %v4577_v35  ;;  %v4666_v35 = vld [vmem:[%s6623_s3 + $0x24] ss:$8 sps:$4 sm:$0xff]  }
  0x98   :  { %1521 = vmatpush1.bf16.msra.mxu1 %v4574_v33  ;;  %1485 = vmatprep.subr.bf16.mxu0 %v4585_v37  ;;  %v4703_v33 = vld [vmem:[%s6623_s3 + $0x150] ss:$8 sps:$4 sm:$0xff]   ;;  %v4664_v37 = vld [vmem:[%s6623_s3 + $0x20] ss:$8 sps:$4 sm:$0xff]  }
  0x99   :  { %1522 = vmatprep.subr.bf16.mxu1 %v4582_v36  ;;  %v4708_v36 = vld [vmem:[%s6623_s3 + $0x144] ss:$8 sps:$4 sm:$0xff]  }
  0x9b   :  { %1486 = vmatpush1.bf16.msra.mxu0 %v4583_v39  ;;  %v4669_v39 = vld [vmem:[%s6623_s3 + $0x14] ss:$8 sps:$4 sm:$0xff]  }
  0x9c   :  { %1523 = vmatpush1.bf16.msra.mxu1 %v4580_v38  ;;  %1487 = vmatprep.subr.bf16.mxu0 %v4591_v41  ;;  %v4706_v38 = vld [vmem:[%s6623_s3 + $0x140] ss:$8 sps:$4 sm:$0xff]   ;;  %v4667_v41 = vld [vmem:[%s6623_s3 + $0x10] ss:$8 sps:$4 sm:$0xff]  }
  0x9d   :  { %1524 = vmatprep.subr.bf16.mxu1 %v4588_v40  ;;  %v4711_v40 = vld [vmem:[%s6623_s3 + $0x134] ss:$8 sps:$4 sm:$0xff]  }
  0x9f   :  { %1488 = vmatpush1.bf16.msra.mxu0 %v4589_v43  ;;  %v4672_v43 = vld [vmem:[%s6623_s3 + $0x4] ss:$8 sps:$4 sm:$0xff]  }
  0xa0   :  { %1525 = vmatpush1.bf16.msra.mxu1 %v4586_v42  ;;  %1489 = vmatprep.subr.bf16.mxu0 %v4597_v45  ;;  %v4709_v42 = vld [vmem:[%s6623_s3 + $0x130] ss:$8 sps:$4 sm:$0xff]   ;;  %v4675_v45 = vld [vmem:[%s6623_s3 + $0xf4] ss:$8 sps:$4 sm:$0xff]  }
  0xa1   :  { %1526 = vmatprep.subr.bf16.mxu1 %v4594_v44  ;;  %v4670_v44 = vld [vmem:[%s6623_s3] ss:$8 sps:$4 sm:$0xff]  }
  0xa3   :  { %1490 = vmatpush2.bf16.msra.mxu0 %v4595_v47  ;;  %v4678_v47 = vld [vmem:[%s6623_s3 + $0xe4] ss:$8 sps:$4 sm:$0xff]  }
  0xa4   :  { %1527 = vmatpush1.bf16.msra.mxu1 %v4592_v46  ;;  %1491 = vmatprep.subr.bf16.mxu0 %v4603_v49  ;;  %v4673_v46 = vld [vmem:[%s6623_s3 + $0xf0] ss:$8 sps:$4 sm:$0xff]   ;;  %v4681_v49 = vld [vmem:[%s6623_s3 + $0xd4] ss:$8 sps:$4 sm:$0xff]  }
  0xa5   :  { %1528 = vmatprep.subr.bf16.mxu1 %v4600_v48  ;;  %v4676_v48 = vld [vmem:[%s6623_s3 + $0xe0] ss:$8 sps:$4 sm:$0xff]  }
  0xa7   :  { %1492 = vmatpush2.bf16.msra.mxu0 %v4601_v51  ;;  %v4684_v51 = vld [vmem:[%s6623_s3 + $0xc4] ss:$8 sps:$4 sm:$0xff]  }
  0xa8   :  { %1529 = vmatpush1.bf16.msra.mxu1 %v4598_v50  ;;  %1493 = vmatprep.subr.bf16.mxu0 %v4609_v54  ;;  %v4679_v50 = vld [vmem:[%s6623_s3 + $0xd0] ss:$8 sps:$4 sm:$0xff]   ;;  %v4687_v54 = vld [vmem:[%s6623_s3 + $0xb4] ss:$8 sps:$4 sm:$0xff]  }
  0xa9   :  { %1530 = vmatprep.subr.bf16.mxu1 %v4606_v53  ;;  %v4682_v53 = vld [vmem:[%s6623_s3 + $0xc0] ss:$8 sps:$4 sm:$0xff]  }
  0xab   :  { %1494 = vmatpush2.bf16.msra.mxu0 %v4607_v56  ;;  %v4690_v56 = vld [vmem:[%s6623_s3 + $0xa4] ss:$8 sps:$4 sm:$0xff]  }
  0xac   :  { %1531 = vmatpush2.bf16.msra.mxu1 %v4604_v55  ;;  %1495 = vmatprep.subr.bf16.mxu0 %v4615_v58  ;;  %v4685_v55 = vld [vmem:[%s6623_s3 + $0xb0] ss:$8 sps:$4 sm:$0xff]   ;;  %v4693_v58 = vld [vmem:[%s6623_s3 + $0x94] ss:$8 sps:$4 sm:$0xff]  }
  0xad   :  { %1532 = vmatprep.subr.bf16.mxu1 %v4612_v57  ;;  %v4688_v57 = vld [vmem:[%s6623_s3 + $0xa0] ss:$8 sps:$4 sm:$0xff]  }
  0xaf   :  { %1496 = vmatpush2.bf16.msra.mxu0 %v4613_v60  ;;  %v4696_v60 = vld [vmem:[%s6623_s3 + $0x84] ss:$8 sps:$4 sm:$0xff]  }
  0xb0   :  { %1533 = vmatpush2.bf16.msra.mxu1 %v4610_v59  ;;  %1497 = vmatprep.subr.bf16.mxu0 %v4621_v62  ;;  %v4691_v59 = vld [vmem:[%s6623_s3 + $0x90] ss:$8 sps:$4 sm:$0xff]  }
  0xb1   :  { %1534 = vmatprep.subr.bf16.mxu1 %v4618_v61 }
  0xb3   :  { %1498 = vmatpush2.bf16.msra.mxu0 %v4619_v0 }
  0xb4   :  { %1535 = vmatpush2.bf16.msra.mxu1 %v4616_v63  ;;  %1499 = vmatprep.subr.bf16.mxu0 %v4627_v2  ;;  %v4694_v63 = vld [vmem:[%s6623_s3 + $0x80] ss:$8 sps:$4 sm:$0xff]   ;;  %v4714_v2 = vld [vmem:[%s6623_s3 + $0x124] ss:$8 sps:$4 sm:$0xff]  }
  0xb5   :  { %1536 = vmatprep.subr.bf16.mxu1 %v4624_v1 }
  0xb7   :  { %1500 = vmatpush2.bf16.msra.mxu0 %v4625_v4 }
  0xb8   :  { %1537 = vmatpush2.bf16.msra.mxu1 %v4622_v3  ;;  %1501 = vmatprep.subr.bf16.mxu0 %v4633_v8  ;;  %v4712_v3 = vld [vmem:[%s6623_s3 + $0x120] ss:$8 sps:$4 sm:$0xff]  }
  0xb9   :  { %1538 = vmatprep.subr.bf16.mxu1 %v4630_v5 }
  0xbb   :  { %1502 = vmatpush2.bf16.msra.mxu0 %v4631_v10  ;;  %v4717_v10 = vld [vmem:[%s6623_s3 + $0x114] ss:$8 sps:$4 sm:$0xff]  }
  0xbc   :  { %1539 = vmatpush2.bf16.msra.mxu1 %v4628_v9  ;;  %1503 = vmatprep.subr.bf16.mxu0 %v4639_v12 }
  0xbd   :  { %1540 = vmatprep.subr.bf16.mxu1 %v4636_v11  ;;  %v4715_v11 = vld [vmem:[%s6623_s3 + $0x110] ss:$8 sps:$4 sm:$0xff]  }
  0xbf   :  { %1504 = vmatpush2.bf16.msra.mxu0 %v4637_v17  ;;  %v4720_v17 = vld [vmem:[%s6623_s3 + $0x104] ss:$8 sps:$4 sm:$0xff]  }
  0xc0   :  { %1541 = vmatpush2.bf16.msra.mxu1 %v4634_v16  ;;  %1569 = vmatprep.subr.bf16.mxu0 %v4645_v19 }
  0xc1   :  { %1542 = vmatprep.subr.bf16.mxu1 %v4642_v18  ;;  %v4718_v18 = vld [vmem:[%s6623_s3 + $0x100] ss:$8 sps:$4 sm:$0xff]  }
  0xc2   :  { %1506 = vmatmul.mubr.bf16.vlgmr.msra.gmra.mxu0 %v5311_v7  ;;  %v4652_v7 = vld [vmem:[%s6623_s3 + $0x60] ss:$8 sps:$4 sm:$0xff]  }
  0xc3   :  { %1570 = vmatpush1.bf16.msra.mxu0 %v4643_v21  ;;  %1587 = vmatprep.mubr.bf16.mxu0 %v5038_v13  ;;  %v4723_v21 = vld [vmem:[%s6623_s3 + $0x184] ss:$8 sps:$4 sm:$0xff]  }
  0xc4   :  { %1543 = vmatpush2.bf16.msra.mxu1 %v4640_v20  ;;  %1919 = vmatprep.subr.bf16.mxu0 %v4651_v23  ;;  %v240_v23 = vlaneseq }
  0xc5   :  { %1544 = vmatprep.subr.bf16.mxu1 %v4648_v22  ;;  %v4721_v22 = vld [vmem:[%s6623_s3 + $0x180] ss:$8 sps:$4 sm:$0xff]  }
  0xc8   :  { %1545 = vmatpush2.bf16.msra.mxu1 %v4646_v24  ;;  %v5887_v24 = vshrl.u32 %v240_v23, 7  ;;  %v4738_v23 = vld [vmem:[%s6625_s5 + $0xa4] ss:$16 sps:$4 sm:$0xff]  }
  0xc9   :  { %1960 = vmatprep.subr.bf16.mxu1 %v4699_v28 }
  0xca   :  { %4054 = vmatmul.mubr.msk.bf16.vlgmr.msra.gmra.mxu0 %vm1264_vm0, %v5337_v15  ;;  %v4660_v15 = vld [vmem:[%s6623_s3 + $0x44] ss:$8 sps:$4 sm:$0xff]  }
  0xcb   :  { %1547 = vmatmul.mubr.bf16.vlgmr.msra.gmra.mxu1 %v5522_v14  ;;  %1920 = vmatpush1.bf16.msra.mxu0 %v4649_v25  ;;  %v4697_v14 = vld [vmem:[%s6623_s3 + $0x170] ss:$8 sps:$4 sm:$0xff]   ;;  %v5890_v25 = vsub.s32 0, %v5887_v24 }
  0xcc   :  { %1921 = vmatprep.subr.bf16.mxu0 %v4654_v26  ;;  %1961 = vmatpush1.bf16.msra.mxu1 %v4697_v14  ;;  %v238_v26 = vld [vmem:[%s6624_s2] sm:$0xf] }
  0xcd   :  { %1962 = vmatprep.subr.bf16.mxu1 %v4702_v29 }
  0xcf   :  { %1922 = vmatpush1.bf16.msra.mxu0 %v4652_v7  ;;  %v5896_v7 = vsub.s32 1, %v5887_v24 }
  0xd0   :  { %1923 = vmatprep.subr.bf16.mxu0 %v4657_v52  ;;  %1963 = vmatpush1.bf16.msra.mxu1 %v4700_v30  ;;  %v243_v52 = vrot.slane %v238_v26, %v5890_v25 }
  0xd1   :  { %1964 = vmatprep.subr.bf16.mxu1 %v4705_v32 }
  0xd3   :  { %1924 = vmatpush1.bf16.msra.mxu0 %v4655_v27  ;;  %v247_v27 = vrot.slane %v238_v26, %v5896_v7 }
  0xd4   :  { %1925 = vmatprep.subr.bf16.mxu0 %v4660_v15  ;;  %1965 = vmatpush1.bf16.msra.mxu1 %v4703_v33 }
  0xd5   :  { %1966 = vmatprep.subr.bf16.mxu1 %v4708_v36 }
  0xd7   :  { %1926 = vmatpush1.bf16.msra.mxu0 %v4658_v6 }
  0xd8   :  { %1927 = vmatprep.subr.bf16.mxu0 %v4663_v31  ;;  %1967 = vmatpush1.bf16.msra.mxu1 %v4706_v38 }
  0xd9   :  { %1968 = vmatprep.subr.bf16.mxu1 %v4711_v40 }
  0xdb   :  { %1928 = vmatpush1.bf16.msra.mxu0 %v4661_v34 }
  0xdc   :  { %1929 = vmatprep.subr.bf16.mxu0 %v4666_v35  ;;  %1969 = vmatpush1.bf16.msra.mxu1 %v4709_v42 }
  0xdd   :  { %1970 = vmatprep.subr.bf16.mxu1 %v4714_v2 }
  0xdf   :  { %1930 = vmatpush1.bf16.msra.mxu0 %v4664_v37 }
  0xe0   :  { %1931 = vmatprep.subr.bf16.mxu0 %v4669_v39  ;;  %1971 = vmatpush1.bf16.msra.mxu1 %v4712_v3 }
  0xe1   :  { %1972 = vmatprep.subr.bf16.mxu1 %v4717_v10 }
  0xe3   :  { %1932 = vmatpush1.bf16.msra.mxu0 %v4667_v41 }
  0xe4   :  { %1933 = vmatprep.subr.bf16.mxu0 %v4672_v43  ;;  %1973 = vmatpush1.bf16.msra.mxu1 %v4715_v11 }
  0xe5   :  { %1974 = vmatprep.subr.bf16.mxu1 %v4720_v17  ;;  %v4727_v17 = vld [vmem:[%s6625_s5 + $0xe8] ss:$16 sps:$4 sm:$0xff]  }
  0xe7   :  { %1934 = vmatpush1.bf16.msra.mxu0 %v4670_v44 }
  0xe8   :  { %1935 = vmatprep.subr.bf16.mxu0 %v4675_v45  ;;  %1975 = vmatpush1.bf16.msra.mxu1 %v4718_v18  ;;  %v5902_v45 = vsub.s32 2, %v5887_v24  ;;  %v4729_v18 = vld [vmem:[%s6625_s5 + $0xec] ss:$16 sps:$4 sm:$0xff]  }
  0xe9   :  { %1990 = vmatprep.subr.bf16.mxu1 %v4723_v21  ;;  %v4730_v21 = vld [vmem:[%s6625_s5 + $0xc0] ss:$16 sps:$4 sm:$0xff]  }
  0xeb   :  { %1936 = vmatpush2.bf16.msra.mxu0 %v4673_v46  ;;  %v5905_v46 = vsub.s32 3, %v5887_v24 }
  0xec   :  { %1937 = vmatprep.subr.bf16.mxu0 %v4678_v47  ;;  %1991 = vmatpush2.bf16.msra.mxu1 %v4721_v22  ;;  %v4733_v22 = vld [vmem:[%s6625_s5 + $0xc8] ss:$16 sps:$4 sm:$0xff]  }
  0xef   :  { %1938 = vmatpush2.bf16.msra.mxu0 %v4676_v48  ;;  %v251_v48 = vrot.slane %v238_v26, %v5902_v45 }
  0xf0   :  { %1939 = vmatprep.subr.bf16.mxu0 %v4681_v49 }
  0xf3   :  { %1940 = vmatpush2.bf16.msra.mxu0 %v4679_v50  ;;  %v255_v50 = vrot.slane %v238_v26, %v5905_v46  ;;  %v4741_v26 = vld [vmem:[%s6625_s5 + $0xac] ss:$16 sps:$4 sm:$0xff]  }
  0xf4   :  { %1941 = vmatprep.subr.bf16.mxu0 %v4684_v51 }
  0xf7   :  { %1942 = vmatpush2.bf16.msra.mxu0 %v4682_v53 }
  0xf8   :  { %1943 = vmatprep.subr.bf16.mxu0 %v4687_v54 }
  0xfb   :  { %1944 = vmatpush2.bf16.msra.mxu0 %v4685_v55 }
  0xfc   :  { %1945 = vmatprep.subr.bf16.mxu0 %v4690_v56 }
  0xff   :  { %1946 = vmatpush2.bf16.msra.mxu0 %v4688_v57 }
 0x100   :  { %1947 = vmatprep.subr.bf16.mxu0 %v4693_v58 }
 0x102   :  { %v1302_v61 = vpop.f32.mrf.mxu0 }
 0x103   :  { %v1343_v62 = vpop.f32.mrf.mxu1  ;;  %1948 = vmatpush2.bf16.msra.mxu0 %v4691_v59  ;;  %v1303_v15 = vadd.f32 %v1302_v61, %v243_v52  ;;  %v4736_v52 = vld [vmem:[%s6625_s5 + $0xa0] ss:$16 sps:$4 sm:$0xff]  }
 0x104   :  { %v1304_v0 = vpop.f32.mrf.mxu0  ;;  %1949 = vmatprep.subr.bf16.mxu0 %v4696_v60 }
 0x105   :  { %v1345_v1 = vpop.f32.mrf.mxu1  ;;  %v1305_v14 = vadd.f32 %v1304_v0, %v247_v27  ;;  %v1344_v28 = vadd.f32 %v1343_v62, %v1303_v15  ;;  %v4739_v27 = vld [vmem:[%s6625_s5 + $0xa8] ss:$16 sps:$4 sm:$0xff]   ;;  %v4744_v15 = vld [vmem:[%s6625_s5 + $0x84] ss:$16 sps:$4 sm:$0xff]  }
 0x106   :  { %v1306_v4 = vpop.f32.mrf.mxu0 }
 0x107   :  { %v1347_v5 = vpop.f32.mrf.mxu1  ;;  %1950 = vmatpush2.bf16.msra.mxu0 %v4694_v63  ;;  %v1346_v6 = vadd.f32 %v1345_v1, %v1305_v14  ;;  %v4747_v14 = vld [vmem:[%s6625_s5 + $0x8c] ss:$16 sps:$4 sm:$0xff]  }
 0x108   :  { %v1307_v8 = vpop.f32.mrf.mxu0  ;;  %2263 = vmatprep.subr.bf16.mxu0 %v4729_v18  ;;  %v4802_v18 = vld [vmem:[%s6626_s7 + $0x4d0] ss:$28 sps:$4 sm:$0xff]  }
 0x109   :  { %v1348_v9 = vpop.f32.mrf.mxu1 }
 0x10b   :  { %v1425_v12 = vpop.f32.mrf.mxu1 }
 0x10d   :  { %v1427_v16 = vpop.f32.mrf.mxu1 }
 0x10f   :  { %v1429_v19 = vpop.f32.mrf.mxu1 }
 0x110   :  { %v4732_v19 = vld [vmem:[%s6625_s5 + $0xc4] ss:$16 sps:$4 sm:$0xff]  }
 0x111   :  { %v1430_v20 = vpop.f32.mrf.mxu1 }
 0x112   :  { %v4735_v20 = vld [vmem:[%s6625_s5 + $0xcc] ss:$16 sps:$4 sm:$0xff]  }
 0x142   :  { %v1384_v29 = vpop.f32.mrf.mxu0 }
 0x143   :  { %v1385_v30 = vadd.f32 %v1384_v29, %v1344_v28  ;;  %v4742_v28 = vld [vmem:[%s6625_s5 + $0x80] ss:$16 sps:$4 sm:$0xff]   ;;  %v4745_v29 = vld [vmem:[%s6625_s5 + $0x88] ss:$16 sps:$4 sm:$0xff]  }
 0x144   :  { %v1386_v31 = vpop.f32.mrf.mxu0 }
 0x145   :  { %v1426_v32 = vadd.f32 %v1425_v12, %v1385_v30  ;;  %v1387_v34 = vadd.f32 %v1386_v31, %v1346_v6  ;;  %v4724_v12 = vld [vmem:[%s6625_s5 + $0xe0] ss:$16 sps:$4 sm:$0xff]   ;;  %v4750_v6 = vld [vmem:[%s6625_s5 + $0x64] ss:$16 sps:$4 sm:$0xff]   ;;  %v4751_v31 = vld [vmem:[%s6625_s5 + $0x68] ss:$16 sps:$4 sm:$0xff]  }
 0x146   :  { %v1388_v33 = vpop.f32.mrf.mxu0  ;;  %v4748_v30 = vld [vmem:[%s6625_s5 + $0x60] ss:$16 sps:$4 sm:$0xff]  }
 0x147   :  { %v1428_v35 = vadd.f32 %v1427_v16, %v1387_v34  ;;  %v1596_v36 = vmax.f32 %v1426_v32, 0.0  ;;  %v4726_v16 = vld [vmem:[%s6625_s5 + $0xe4] ss:$16 sps:$4 sm:$0xff]   ;;  %v4753_v32 = vld [vmem:[%s6625_s5 + $0x6c] ss:$16 sps:$4 sm:$0xff]  }
 0x148   :  { %v1389_v37 = vpop.f32.mrf.mxu0  ;;  %2222 = vmatprep.subr.bf16.mxu1 %v4726_v16  ;;  %v4756_v34 = vld [vmem:[%s6625_s5 + $0x44] ss:$16 sps:$4 sm:$0xff]   ;;  %v4759_v33 = vld [vmem:[%s6625_s5 + $0x4c] ss:$16 sps:$4 sm:$0xff]  }
 0x149   :  { %v1597_v38 = vmax.f32 %v1428_v35, 0.0  ;;  %v1600_v41 = vpack.c.bf16 %v1596_v36, %v1596_v36  ;;  %v4754_v35 = vld [vmem:[%s6625_s5 + $0x40] ss:$16 sps:$4 sm:$0xff]   ;;  %v4757_v36 = vld [vmem:[%s6625_s5 + $0x48] ss:$16 sps:$4 sm:$0xff]  }
 0x14a   :  { %v4762_v37 = vld [vmem:[%s6625_s5 + $0x24] ss:$16 sps:$4 sm:$0xff]  }
 0x14b   :  { %v1466_v39 = vpop.f32.mrf.mxu1  ;;  %v1601_v40 = vpack.c.bf16 %v1597_v38, %v1597_v38  ;;  %v4765_v38 = vld [vmem:[%s6625_s5 + $0x2c] ss:$16 sps:$4 sm:$0xff]   ;;  %v4804_v16 = vld [vmem:[%s6626_s7 + $0x4d4] ss:$28 sps:$4 sm:$0xff]  }
 0x14c   :  { %v1467_v53 = vadd.f32 %v1466_v39, %v251_v48  ;;  %v4760_v39 = vld [vmem:[%s6625_s5 + $0x20] ss:$16 sps:$4 sm:$0xff]   ;;  %v4798_v48 = vld [vmem:[%s6626_s7 + $0x50c] ss:$28 sps:$4 sm:$0xff]  }
 0x14d   :  { %v1468_v42 = vpop.f32.mrf.mxu1  ;;  %1951 = vmatprep.mubr.bf16.mxu0 %v1601_v40  ;;  %v4763_v40 = vld [vmem:[%s6625_s5 + $0x28] ss:$16 sps:$4 sm:$0xff]  }
 0x14e   :  { %1952 = vmatmul.mubr.bf16.vlgmr.msra.gmra.mxu0 %v1600_v41  ;;  %v1469_v55 = vadd.f32 %v1468_v42, %v255_v50  ;;  %v4768_v41 = vld [vmem:[%s6625_s5 + $0x4] ss:$16 sps:$4 sm:$0xff]   ;;  %v4771_v42 = vld [vmem:[%s6625_s5 + $0xc] ss:$16 sps:$4 sm:$0xff]  }
 0x14f   :  { %v1470_v43 = vpop.f32.mrf.mxu1  ;;  %2295 = vmatprep.mubr.bf16.mxu0 %v5038_v13  ;;  %2264 = vmatpush1.bf16.msra.mxu0 %v4727_v17  ;;  %v4775_v17 = vld [vmem:[%s6626_s7 + $0x150] ss:$28 sps:$4 sm:$0xff]  }
 0x150   :  { %2265 = vmatprep.subr.bf16.mxu0 %v4735_v20  ;;  %v4766_v43 = vld [vmem:[%s6625_s5] ss:$16 sps:$4 sm:$0xff]   ;;  %v4810_v20 = vld [vmem:[%s6626_s7 + $0x49c] ss:$28 sps:$4 sm:$0xff]  }
 0x151   :  { %v1471_v44 = vpop.f32.mrf.mxu1 }
 0x152   :  { %v4769_v44 = vld [vmem:[%s6625_s5 + $0x8] ss:$16 sps:$4 sm:$0xff]  }
 0x153   :  { %2266 = vmatpush1.bf16.msra.mxu0 %v4733_v22  ;;  %v4808_v22 = vld [vmem:[%s6626_s7 + $0x498] ss:$28 sps:$4 sm:$0xff]  }
 0x154   :  { %2267 = vmatprep.subr.bf16.mxu0 %v4741_v26  ;;  %v4816_v26 = vld [vmem:[%s6626_s7 + $0x464] ss:$28 sps:$4 sm:$0xff]  }
 0x157   :  { %2268 = vmatpush1.bf16.msra.mxu0 %v4739_v27  ;;  %v4814_v27 = vld [vmem:[%s6626_s7 + $0x460] ss:$28 sps:$4 sm:$0xff]  }
 0x158   :  { %2269 = vmatprep.subr.bf16.mxu0 %v4747_v14  ;;  %v4822_v14 = vld [vmem:[%s6626_s7 + $0x42c] ss:$28 sps:$4 sm:$0xff]  }
 0x15b   :  { %2270 = vmatpush1.bf16.msra.mxu0 %v4745_v29  ;;  %v4820_v29 = vld [vmem:[%s6626_s7 + $0x428] ss:$28 sps:$4 sm:$0xff]  }
 0x15c   :  { %2271 = vmatprep.subr.bf16.mxu0 %v4753_v32  ;;  %v4826_v32 = vld [vmem:[%s6626_s7 + $0x3f0] ss:$28 sps:$4 sm:$0xff]  }
 0x15f   :  { %2272 = vmatpush1.bf16.msra.mxu0 %v4751_v31  ;;  %v4787_v31 = vld [vmem:[%s6626_s7 + $0x70] ss:$28 sps:$4 sm:$0xff]  }
 0x160   :  { %2273 = vmatprep.subr.bf16.mxu0 %v4759_v33  ;;  %v4834_v33 = vld [vmem:[%s6626_s7 + $0x3bc] ss:$28 sps:$4 sm:$0xff]  }
 0x163   :  { %2274 = vmatpush1.bf16.msra.mxu0 %v4757_v36  ;;  %v4832_v36 = vld [vmem:[%s6626_s7 + $0x3b8] ss:$28 sps:$4 sm:$0xff]  }
 0x164   :  { %2275 = vmatprep.subr.bf16.mxu0 %v4765_v38  ;;  %v4793_v38 = vld [vmem:[%s6626_s7] ss:$28 sps:$4 sm:$0xff]  }
 0x167   :  { %2276 = vmatpush1.bf16.msra.mxu0 %v4763_v40  ;;  %v4799_v40 = vld [vmem:[%s6626_s7 + $0x348] ss:$28 sps:$4 sm:$0xff]  }
 0x168   :  { %2277 = vmatprep.subr.bf16.mxu0 %v4771_v42  ;;  %v4805_v42 = vld [vmem:[%s6626_s7 + $0x310] ss:$28 sps:$4 sm:$0xff]  }
 0x16b   :  { %2278 = vmatpush1.bf16.msra.mxu0 %v4769_v44  ;;  %v4811_v44 = vld [vmem:[%s6626_s7 + $0x2d8] ss:$28 sps:$4 sm:$0xff]  }
 0x16c   :  { %3493 = vmatprep.subr.bf16.mxu0 %v4798_v48  ;;  %v4817_v48 = vld [vmem:[%s6626_s7 + $0x2a0] ss:$28 sps:$4 sm:$0xff]  }
 0x182   :  { %v1507_v47 = vpop.f32.mrf.mxu0 }
 0x183   :  { %v1508_v56 = vadd.f32 %v1507_v47, %v1467_v53  ;;  %v4774_v47 = vld [vmem:[%s6626_s7 + $0x18c] ss:$28 sps:$4 sm:$0xff]  }
 0x184   :  { %v1509_v49 = vpop.f32.mrf.mxu0 }
 0x185   :  { %v1510_v59 = vadd.f32 %v1509_v49, %v1469_v55 }
 0x186   :  { %v1511_v51 = vpop.f32.mrf.mxu0 }
 0x188   :  { %v1512_v54 = vpop.f32.mrf.mxu0 }
 0x189   :  { %v1654_v54 = vld [vmem:[%s6627_s4] sm:$0x3] }
 0x18a   :  { %v1589_v58 = vpop.f32.mrf.mxu0  ;;  %v1659_v55 = vrot.slane %v1654_v54, %v5890_v25 }
 0x18b   :  { %v1548_v57 = vpop.f32.mrf.mxu1 }
 0x18c   :  { %v1549_v60 = vadd.f32 %v1548_v57, %v1508_v56  ;;  %v1591_v62 = vpop.f32.mrf.mxu0  ;;  %v1663_v56 = vrot.slane %v1654_v54, %v5896_v7  ;;  %v4837_v54 = vld [vmem:[%s6626_s7 + $0x1fc] ss:$28 sps:$4 sm:$0xff]  }
 0x18d   :  { %v1550_v61 = vpop.f32.mrf.mxu1 }
 0x18e   :  { %v1590_v63 = vadd.f32 %v1589_v58, %v1549_v60  ;;  %v1551_v0 = vadd.f32 %v1550_v61, %v1510_v59  ;;  %v1593_v2 = vpop.f32.mrf.mxu0 }
 0x18f   :  { %v1552_v1 = vpop.f32.mrf.mxu1 }
 0x190   :  { %v1592_v3 = vadd.f32 %v1591_v62, %v1551_v0  ;;  %v1598_v4 = vmax.f32 %v1590_v63, 0.0  ;;  %v1594_v8 = vpop.f32.mrf.mxu0 }
 0x191   :  { %v1553_v5 = vpop.f32.mrf.mxu1 }
 0x192   :  { %v1599_v9 = vmax.f32 %v1592_v3, 0.0  ;;  %v1602_v11 = vpack.c.bf16 %v1598_v4, %v1598_v4  ;;  %v2001_v3 = vld [vmem:[%s6629_s9] sm:$0xff] }
 0x194   :  { %v1603_v10 = vpack.c.bf16 %v1599_v9, %v1599_v9  ;;  %v4772_v9 = vld [vmem:[%s6626_s7 + $0x188] ss:$28 sps:$4 sm:$0xff]  }
 0x196   :  { %4105 = vmatprep.mubr.msk.bf16.mxu1 %vm1264_vm0, %v1603_v10  ;;  %v4796_v10 = vld [vmem:[%s6626_s7 + $0x508] ss:$28 sps:$4 sm:$0xff]  }
 0x197   :  { %1993 = vmatmul.mubr.bf16.vlgmr.msra.gmra.mxu1 %v1602_v11 }
 0x198   :  { %2254 = vmatprep.mubr.bf16.mxu1 %v5038_v13  ;;  %2223 = vmatpush1.bf16.msra.mxu1 %v4724_v12  ;;  %v4777_v12 = vld [vmem:[%s6626_s7 + $0x154] ss:$28 sps:$4 sm:$0xff]  }
 0x199   :  { %2224 = vmatprep.subr.bf16.mxu1 %v4732_v19  ;;  %v4780_v19 = vld [vmem:[%s6626_s7 + $0x11c] ss:$28 sps:$4 sm:$0xff]  }
 0x19c   :  { %2225 = vmatpush1.bf16.msra.mxu1 %v4730_v21  ;;  %v4778_v21 = vld [vmem:[%s6626_s7 + $0x118] ss:$28 sps:$4 sm:$0xff]  }
 0x19d   :  { %2226 = vmatprep.subr.bf16.mxu1 %v4738_v23  ;;  %v4783_v23 = vld [vmem:[%s6626_s7 + $0xe4] ss:$28 sps:$4 sm:$0xff]  }
 0x1a0   :  { %2227 = vmatpush1.bf16.msra.mxu1 %v4736_v52  ;;  %v4781_v52 = vld [vmem:[%s6626_s7 + $0xe0] ss:$28 sps:$4 sm:$0xff]  }
 0x1a1   :  { %2228 = vmatprep.subr.bf16.mxu1 %v4744_v15  ;;  %v4786_v15 = vld [vmem:[%s6626_s7 + $0xac] ss:$28 sps:$4 sm:$0xff]  }
 0x1a4   :  { %2229 = vmatpush1.bf16.msra.mxu1 %v4742_v28  ;;  %v4784_v28 = vld [vmem:[%s6626_s7 + $0xa8] ss:$28 sps:$4 sm:$0xff]  }
 0x1a5   :  { %2230 = vmatprep.subr.bf16.mxu1 %v4750_v6  ;;  %v4789_v6 = vld [vmem:[%s6626_s7 + $0x74] ss:$28 sps:$4 sm:$0xff]  }
 0x1a8   :  { %2231 = vmatpush1.bf16.msra.mxu1 %v4748_v30  ;;  %v4828_v30 = vld [vmem:[%s6626_s7 + $0x3f4] ss:$28 sps:$4 sm:$0xff]  }
 0x1a9   :  { %2232 = vmatprep.subr.bf16.mxu1 %v4756_v34  ;;  %v4792_v34 = vld [vmem:[%s6626_s7 + $0x3c] ss:$28 sps:$4 sm:$0xff]  }
 0x1ac   :  { %2233 = vmatpush1.bf16.msra.mxu1 %v4754_v35  ;;  %v4790_v35 = vld [vmem:[%s6626_s7 + $0x38] ss:$28 sps:$4 sm:$0xff]  }
 0x1ad   :  { %2234 = vmatprep.subr.bf16.mxu1 %v4762_v37  ;;  %v4795_v37 = vld [vmem:[%s6626_s7 + $0x4] ss:$28 sps:$4 sm:$0xff]  }
 0x1b0   :  { %2235 = vmatpush1.bf16.msra.mxu1 %v4760_v39  ;;  %v4801_v39 = vld [vmem:[%s6626_s7 + $0x34c] ss:$28 sps:$4 sm:$0xff]  }
 0x1b1   :  { %2236 = vmatprep.subr.bf16.mxu1 %v4768_v41  ;;  %v4807_v41 = vld [vmem:[%s6626_s7 + $0x314] ss:$28 sps:$4 sm:$0xff]  }
 0x1b4   :  { %2237 = vmatpush1.bf16.msra.mxu1 %v4766_v43  ;;  %v4813_v43 = vld [vmem:[%s6626_s7 + $0x2dc] ss:$28 sps:$4 sm:$0xff]  }
 0x1b5   :  { %3452 = vmatprep.subr.bf16.mxu1 %v4774_v47  ;;  %v4819_v47 = vld [vmem:[%s6626_s7 + $0x2a4] ss:$28 sps:$4 sm:$0xff]  }
 0x20e   :  { %v1953_v49 = vpop.f32.mrf.mxu0 }
 0x20f   :  { %v1954_v57 = vadd.f32 %v1953_v49, %v1659_v55  ;;  %v4825_v49 = vld [vmem:[%s6626_s7 + $0x26c] ss:$28 sps:$4 sm:$0xff]   ;;  %v4840_v55 = vld [vmem:[%s6626_s7 + $0x384] ss:$28 sps:$4 sm:$0xff]  }
 0x210   :  { %v1955_v50 = vpop.f32.mrf.mxu0 }
 0x211   :  { %v1956_v59 = vadd.f32 %v1955_v50, %v1663_v56  ;;  %v4823_v50 = vld [vmem:[%s6626_s7 + $0x268] ss:$28 sps:$4 sm:$0xff]   ;;  %v4835_v56 = vld [vmem:[%s6626_s7 + $0x1f8] ss:$28 sps:$4 sm:$0xff]  }
 0x212   :  { %v1957_v51 = vpop.f32.mrf.mxu0 }
 0x213   :  { %v4831_v51 = vld [vmem:[%s6626_s7 + $0x234] ss:$28 sps:$4 sm:$0xff]  }
 0x214   :  { %v1958_v53 = vpop.f32.mrf.mxu0 }
 0x215   :  { %v4829_v53 = vld [vmem:[%s6626_s7 + $0x230] ss:$28 sps:$4 sm:$0xff]  }
 0x257   :  { %v1994_v58 = vpop.f32.mrf.mxu1 }
 0x258   :  { %v1995_v60 = vadd.f32 %v1994_v58, %v1954_v57  ;;  %v4838_v57 = vld [vmem:[%s6626_s7 + $0x380] ss:$28 sps:$4 sm:$0xff]  }
 0x259   :  { %v1996_v61 = vpop.f32.mrf.mxu1  ;;  %v4843_v58 = vld [vmem:[%s6626_s7 + $0x1c4] ss:$28 sps:$4 sm:$0xff]  }
 0x25a   :  { %3840 = vst [vmem:[%s6628_s11] sm:$0xff] %v1995_v60  ;;  %v1997_v62 = vadd.f32 %v1996_v61, %v1956_v59  ;;  %v4846_v59 = vld [vmem:[%s6626_s7 + $0x544] ss:$28 sps:$4 sm:$0xff]  }
 0x25b   :  { %v1998_v63 = vpop.f32.mrf.mxu1  ;;  %v4844_v61 = vld [vmem:[%s6626_s7 + $0x540] ss:$28 sps:$4 sm:$0xff]  }
 0x25c   :  { %v2002_v0 = vmul.f32 0.5, %v1997_v62  ;;  %3841 = vst [vmem:[%s6628_s11 + $0x8] sm:$0xff] %v1997_v62  ;;  %v4849_v62 = vld [vmem:[%s6626_s7 + $0x194] ss:$28 sps:$4 sm:$0xff]  }
 0x25d   :  { %v1999_v1 = vpop.f32.mrf.mxu1  ;;  %v4852_v63 = vld [vmem:[%s6626_s7 + $0x514] ss:$28 sps:$4 sm:$0xff]  }
 0x25e   :  { %v2003_v2 = vmul.f32 1.442695, %v2002_v0  ;;  %v2040_v0 = vld [vmem:[%s6630_s6] sm:$0xf] }
 0x25f   :  { %v2045_v1 = vrot.slane %v2040_v0, %v5890_v25 }
 0x260   :  { %5022 = vpow2.f32 %v2003_v2  ;;  %v2053_v2 = vrot.slane %v2040_v0, %v5902_v45 }
 0x26d   :  { %v5023_v4 = vpop.eup %5022 }
 0x26e   :  { %v2005_v5 = vmul.f32 %v5023_v4, %v2001_v3  ;;  %v2049_v3 = vrot.slane %v2040_v0, %v5896_v7  ;;  %v2057_v4 = vrot.slane %v2040_v0, %v5905_v46  ;;  %v4898_v0 = vld [vmem:[%s6626_s7 + $0x548] ss:$28 sps:$4 sm:$0xff]  }
 0x270   :  { %v2006_v8 = vadd.f32 %v2005_v5, %v1995_v60  ;;  %v4841_v60 = vld [vmem:[%s6626_s7 + $0x1c0] ss:$28 sps:$4 sm:$0xff]  }
 0x272   :  { %v2007_v11 = vpack.c.bf16 %v2006_v8, %v2006_v8 }
 0x274   :  { %2255 = vmatmul.mubr.bf16.vlgmr.msra.gmra.mxu1 %v2007_v11  ;;  %2296 = vmatmul.mubr.bf16.vlgmr.msra.gmra.mxu0 %v2007_v11 }
 0x275   :  { %3453 = vmatpush1.bf16.msra.mxu1 %v4772_v9  ;;  %3494 = vmatpush1.bf16.msra.mxu0 %v4796_v10 }
 0x276   :  { %3454 = vmatprep.subr.bf16.mxu1 %v4777_v12  ;;  %3495 = vmatprep.subr.bf16.mxu0 %v4804_v16 }
 0x279   :  { %3455 = vmatpush1.bf16.msra.mxu1 %v4775_v17  ;;  %3496 = vmatpush1.bf16.msra.mxu0 %v4802_v18 }
 0x27a   :  { %3456 = vmatprep.subr.bf16.mxu1 %v4780_v19  ;;  %3497 = vmatprep.subr.bf16.mxu0 %v4810_v20 }
 0x27d   :  { %3457 = vmatpush1.bf16.msra.mxu1 %v4778_v21  ;;  %3498 = vmatpush1.bf16.msra.mxu0 %v4808_v22 }
 0x27e   :  { %3458 = vmatprep.subr.bf16.mxu1 %v4783_v23  ;;  %3499 = vmatprep.subr.bf16.mxu0 %v4816_v26 }
 0x281   :  { %3459 = vmatpush1.bf16.msra.mxu1 %v4781_v52  ;;  %3500 = vmatpush1.bf16.msra.mxu0 %v4814_v27 }
 0x282   :  { %3460 = vmatprep.subr.bf16.mxu1 %v4786_v15  ;;  %3501 = vmatprep.subr.bf16.mxu0 %v4822_v14  ;;  %v4847_v14 = vld [vmem:[%s6626_s7 + $0x190] ss:$28 sps:$4 sm:$0xff]  }
 0x285   :  { %3461 = vmatpush1.bf16.msra.mxu1 %v4784_v28  ;;  %3502 = vmatpush1.bf16.msra.mxu0 %v4820_v29  ;;  %v4850_v28 = vld [vmem:[%s6626_s7 + $0x510] ss:$28 sps:$4 sm:$0xff]  }
 0x286   :  { %3462 = vmatprep.subr.bf16.mxu1 %v4789_v6  ;;  %3503 = vmatprep.subr.bf16.mxu0 %v4828_v30  ;;  %v4855_v30 = vld [vmem:[%s6626_s7 + $0x15c] ss:$28 sps:$4 sm:$0xff]  }
 0x289   :  { %3463 = vmatpush1.bf16.msra.mxu1 %v4787_v31  ;;  %3504 = vmatpush1.bf16.msra.mxu0 %v4826_v32  ;;  %v4858_v31 = vld [vmem:[%s6626_s7 + $0x4dc] ss:$28 sps:$4 sm:$0xff]  }
 0x28a   :  { %3464 = vmatprep.subr.bf16.mxu1 %v4792_v34  ;;  %3505 = vmatprep.subr.bf16.mxu0 %v4834_v33  ;;  %v4853_v32 = vld [vmem:[%s6626_s7 + $0x158] ss:$28 sps:$4 sm:$0xff]   ;;  %v4861_v33 = vld [vmem:[%s6626_s7 + $0x124] ss:$28 sps:$4 sm:$0xff]  }
 0x28b   :  { %v4856_v34 = vld [vmem:[%s6626_s7 + $0x4d8] ss:$28 sps:$4 sm:$0xff]  }
 0x28d   :  { %3465 = vmatpush1.bf16.msra.mxu1 %v4790_v35  ;;  %3506 = vmatpush1.bf16.msra.mxu0 %v4832_v36  ;;  %v4864_v35 = vld [vmem:[%s6626_s7 + $0x4a4] ss:$28 sps:$4 sm:$0xff]  }
 0x28e   :  { %3466 = vmatprep.subr.bf16.mxu1 %v4795_v37  ;;  %3507 = vmatprep.subr.bf16.mxu0 %v4840_v55  ;;  %v4859_v36 = vld [vmem:[%s6626_s7 + $0x120] ss:$28 sps:$4 sm:$0xff]  }
 0x28f   :  { %v4862_v37 = vld [vmem:[%s6626_s7 + $0x4a0] ss:$28 sps:$4 sm:$0xff]  }
 0x290   :  { %v4883_v55 = vld [vmem:[%s6626_s7 + $0x40] ss:$28 sps:$4 sm:$0xff]  }
 0x291   :  { %3467 = vmatpush1.bf16.msra.mxu1 %v4793_v38  ;;  %3508 = vmatpush1.bf16.msra.mxu0 %v4838_v57  ;;  %v4867_v38 = vld [vmem:[%s6626_s7 + $0xec] ss:$28 sps:$4 sm:$0xff]  }
 0x292   :  { %3468 = vmatprep.subr.bf16.mxu1 %v4801_v39  ;;  %3523 = vmatprep.subr.bf16.mxu0 %v4846_v59  ;;  %v4870_v39 = vld [vmem:[%s6626_s7 + $0x46c] ss:$28 sps:$4 sm:$0xff]  }
 0x293   :  { %v4891_v57 = vld [vmem:[%s6626_s7 + $0xc] ss:$28 sps:$4 sm:$0xff]  }
 0x294   :  { %v4889_v59 = vld [vmem:[%s6626_s7 + $0x8] ss:$28 sps:$4 sm:$0xff]  }
 0x295   :  { %3469 = vmatpush2.bf16.msra.mxu1 %v4799_v40  ;;  %3524 = vmatpush2.bf16.msra.mxu0 %v4844_v61  ;;  %v4865_v40 = vld [vmem:[%s6626_s7 + $0xe8] ss:$28 sps:$4 sm:$0xff]   ;;  %v4897_v61 = vld [vmem:[%s6626_s7 + $0x354] ss:$28 sps:$4 sm:$0xff]  }
 0x296   :  { %3470 = vmatprep.subr.bf16.mxu1 %v4807_v41  ;;  %3534 = vmatprep.subr.bf16.mxu0 %v4849_v62  ;;  %v4868_v41 = vld [vmem:[%s6626_s7 + $0x468] ss:$28 sps:$4 sm:$0xff]  }
 0x297   :  { %v4900_v62 = vld [vmem:[%s6626_s7 + $0x54c] ss:$28 sps:$4 sm:$0xff]  }
 0x299   :  { %3471 = vmatpush2.bf16.msra.mxu1 %v4805_v42  ;;  %v4873_v42 = vld [vmem:[%s6626_s7 + $0xb4] ss:$28 sps:$4 sm:$0xff]  }
 0x29a   :  { %3472 = vmatprep.subr.bf16.mxu1 %v4813_v43  ;;  %v4876_v43 = vld [vmem:[%s6626_s7 + $0x434] ss:$28 sps:$4 sm:$0xff]  }
 0x29d   :  { %3473 = vmatpush2.bf16.msra.mxu1 %v4811_v44  ;;  %v4871_v44 = vld [vmem:[%s6626_s7 + $0xb0] ss:$28 sps:$4 sm:$0xff]  }
 0x29e   :  { %3474 = vmatprep.subr.bf16.mxu1 %v4819_v47  ;;  %v4874_v47 = vld [vmem:[%s6626_s7 + $0x430] ss:$28 sps:$4 sm:$0xff]  }
 0x2a1   :  { %3475 = vmatpush2.bf16.msra.mxu1 %v4817_v48  ;;  %v4879_v48 = vld [vmem:[%s6626_s7 + $0x7c] ss:$28 sps:$4 sm:$0xff]  }
 0x2a2   :  { %3476 = vmatprep.subr.bf16.mxu1 %v4825_v49  ;;  %v4882_v49 = vld [vmem:[%s6626_s7 + $0x3fc] ss:$28 sps:$4 sm:$0xff]  }
 0x2a5   :  { %3477 = vmatpush2.bf16.msra.mxu1 %v4823_v50  ;;  %v4877_v50 = vld [vmem:[%s6626_s7 + $0x78] ss:$28 sps:$4 sm:$0xff]  }
 0x2a6   :  { %3478 = vmatprep.subr.bf16.mxu1 %v4831_v51  ;;  %v4880_v51 = vld [vmem:[%s6626_s7 + $0x3f8] ss:$28 sps:$4 sm:$0xff]  }
 0x2a9   :  { %3479 = vmatpush2.bf16.msra.mxu1 %v4829_v53  ;;  %v4885_v53 = vld [vmem:[%s6626_s7 + $0x44] ss:$28 sps:$4 sm:$0xff]  }
 0x2aa   :  { %3480 = vmatprep.subr.bf16.mxu1 %v4837_v54  ;;  %v4888_v54 = vld [vmem:[%s6626_s7 + $0x3c4] ss:$28 sps:$4 sm:$0xff]  }
 0x2ad   :  { %3481 = vmatpush2.bf16.msra.mxu1 %v4835_v56  ;;  %v4886_v56 = vld [vmem:[%s6626_s7 + $0x3c0] ss:$28 sps:$4 sm:$0xff]  }
 0x2ae   :  { %3482 = vmatprep.subr.bf16.mxu1 %v4843_v58  ;;  %v4894_v58 = vld [vmem:[%s6626_s7 + $0x38c] ss:$28 sps:$4 sm:$0xff]  }
 0x2b1   :  { %3483 = vmatpush2.bf16.msra.mxu1 %v4841_v60  ;;  %v4892_v60 = vld [vmem:[%s6626_s7 + $0x388] ss:$28 sps:$4 sm:$0xff]  }
 0x2b2   :  { %3575 = vmatprep.subr.bf16.mxu1 %v4852_v63  ;;  %v4895_v63 = vld [vmem:[%s6626_s7 + $0x350] ss:$28 sps:$4 sm:$0xff]  }
 0x334   :  { %v2256_v5 = vpop.f32.mrf.mxu1  ;;  %v2297_v8 = vpop.f32.mrf.mxu0 }
 0x335   :  { %v2257_v9 = vadd.f32 %v2256_v5, %v2045_v1  ;;  %v2298_v10 = vadd.f32 %v2297_v8, %v2053_v2  ;;  %v4903_v1 = vld [vmem:[%s6626_s7 + $0x31c] ss:$28 sps:$4 sm:$0xff]   ;;  %v4909_v5 = vld [vmem:[%s6626_s7 + $0x2e4] ss:$28 sps:$4 sm:$0xff]  }
 0x336   :  { %v2258_v11 = vpop.f32.mrf.mxu1  ;;  %v2299_v12 = vpop.f32.mrf.mxu0  ;;  %v4906_v2 = vld [vmem:[%s6626_s7 + $0x19c] ss:$28 sps:$4 sm:$0xff]   ;;  %v4912_v8 = vld [vmem:[%s6626_s7 + $0x164] ss:$28 sps:$4 sm:$0xff]  }
 0x337   :  { %v2259_v16 = vadd.f32 %v2258_v11, %v2049_v3  ;;  %v2300_v17 = vadd.f32 %v2299_v12, %v2057_v4  ;;  %v2304_v18 = vmax.f32 %v2257_v9, 0.0  ;;  %v2306_v19 = vmax.f32 %v2298_v10, 0.0  ;;  %v4901_v3 = vld [vmem:[%s6626_s7 + $0x318] ss:$28 sps:$4 sm:$0xff]   ;;  %v4907_v9 = vld [vmem:[%s6626_s7 + $0x2e0] ss:$28 sps:$4 sm:$0xff]  }
 0x338   :  { %v2260_v20 = vpop.f32.mrf.mxu1  ;;  %v2301_v21 = vpop.f32.mrf.mxu0  ;;  %v4904_v4 = vld [vmem:[%s6626_s7 + $0x198] ss:$28 sps:$4 sm:$0xff]   ;;  %v4910_v10 = vld [vmem:[%s6626_s7 + $0x160] ss:$28 sps:$4 sm:$0xff]   ;;  %v4915_v11 = vld [vmem:[%s6626_s7 + $0x2ac] ss:$28 sps:$4 sm:$0xff]  }
 0x339   :  { %v2305_v22 = vmax.f32 %v2259_v16, 0.0  ;;  %v2307_v23 = vmax.f32 %v2300_v17, 0.0  ;;  %v6194_v29 = vpack.c.bf16 %v2304_v18, %v2304_v18  ;;  %v6196_v6 = vpack.c.bf16 %v2306_v19, %v2306_v19  ;;  %v4918_v12 = vld [vmem:[%s6626_s7 + $0x12c] ss:$28 sps:$4 sm:$0xff]   ;;  %v4921_v18 = vld [vmem:[%s6626_s7 + $0x274] ss:$28 sps:$4 sm:$0xff]  }
 0x33a   :  { %v2261_v26 = vpop.f32.mrf.mxu1  ;;  %v2302_v52 = vpop.f32.mrf.mxu0  ;;  %v4913_v16 = vld [vmem:[%s6626_s7 + $0x2a8] ss:$28 sps:$4 sm:$0xff]   ;;  %v4924_v19 = vld [vmem:[%s6626_s7 + $0xf4] ss:$28 sps:$4 sm:$0xff]  }
 0x33b   :  { %v6184_v27 = vpack.c.bf16 %v2305_v22, %v2305_v22  ;;  %v6186_v15 = vpack.c.bf16 %v2307_v23, %v2307_v23  ;;  %v4916_v17 = vld [vmem:[%s6626_s7 + $0x128] ss:$28 sps:$4 sm:$0xff]   ;;  %v4919_v20 = vld [vmem:[%s6626_s7 + $0x270] ss:$28 sps:$4 sm:$0xff]   ;;  %v4927_v22 = vld [vmem:[%s6626_s7 + $0x23c] ss:$28 sps:$4 sm:$0xff]  }
 0x33c   :  { %v4922_v21 = vld [vmem:[%s6626_s7 + $0xf0] ss:$28 sps:$4 sm:$0xff]   ;;  %v4930_v23 = vld [vmem:[%s6626_s7 + $0xbc] ss:$28 sps:$4 sm:$0xff]  }
 0x33d   :  { %3484 = vmatprep.mubr.bf16.mxu1 %v6184_v27  ;;  %4313 = vmatprep.mubr.msk.bf16.mxu0 %vm1264_vm0, %v6186_v15  ;;  %v4925_v26 = vld [vmem:[%s6626_s7 + $0x238] ss:$28 sps:$4 sm:$0xff]  }
 0x33e   :  { %3485 = vmatmul.mubr.bf16.vlgmr.msra.gmra.mxu1 %v6194_v29  ;;  %3526 = vmatmul.mubr.bf16.vlgmr.msra.gmra.mxu0 %v6196_v6  ;;  %v4928_v52 = vld [vmem:[%s6626_s7 + $0xb8] ss:$28 sps:$4 sm:$0xff]  }
 0x33f   :  { %3535 = vmatpush1.bf16.msra.mxu0 %v4847_v14  ;;  %3576 = vmatpush1.bf16.msra.mxu1 %v4850_v28  ;;  %v4933_v14 = vld [vmem:[%s6626_s7 + $0x204] ss:$28 sps:$4 sm:$0xff]  }
 0x340   :  { %3566 = vmatprep.mubr.bf16.mxu0 %v6184_v27  ;;  %4314 = vmatprep.mubr.msk.bf16.mxu1 %vm1264_vm0, %v6186_v15  ;;  %v4936_v28 = vld [vmem:[%s6626_s7 + $0x84] ss:$28 sps:$4 sm:$0xff]  }
 0x341   :  { %3536 = vmatprep.subr.bf16.mxu0 %v4855_v30  ;;  %3577 = vmatprep.subr.bf16.mxu1 %v4858_v31  ;;  %v4931_v30 = vld [vmem:[%s6626_s7 + $0x200] ss:$28 sps:$4 sm:$0xff]  }
 0x342   :  { %v4934_v31 = vld [vmem:[%s6626_s7 + $0x80] ss:$28 sps:$4 sm:$0xff]  }
 0x343   :  { %3537 = vmatpush1.bf16.msra.mxu0 %v4853_v32  ;;  %3578 = vmatpush1.bf16.msra.mxu1 %v4856_v34  ;;  %v4939_v32 = vld [vmem:[%s6626_s7 + $0x1cc] ss:$28 sps:$4 sm:$0xff]  }
 0x344   :  { %3538 = vmatprep.subr.bf16.mxu0 %v4861_v33  ;;  %3579 = vmatprep.subr.bf16.mxu1 %v4864_v35  ;;  %v4942_v34 = vld [vmem:[%s6626_s7 + $0x4c] ss:$28 sps:$4 sm:$0xff]  }
 0x345   :  { %v4937_v33 = vld [vmem:[%s6626_s7 + $0x1c8] ss:$28 sps:$4 sm:$0xff]  }
 0x346   :  { %v4940_v35 = vld [vmem:[%s6626_s7 + $0x48] ss:$28 sps:$4 sm:$0xff]  }
 0x347   :  { %3539 = vmatpush1.bf16.msra.mxu0 %v4859_v36  ;;  %3580 = vmatpush1.bf16.msra.mxu1 %v4862_v37  ;;  %v4945_v36 = vld [vmem:[%s6626_s7 + $0x14] ss:$28 sps:$4 sm:$0xff]   ;;  %v4948_v37 = vld [vmem:[%s6626_s7 + $0x51c] ss:$28 sps:$4 sm:$0xff]  }
 0x348   :  { %3540 = vmatprep.subr.bf16.mxu0 %v4867_v38  ;;  %3581 = vmatprep.subr.bf16.mxu1 %v4870_v39  ;;  %v4943_v38 = vld [vmem:[%s6626_s7 + $0x10] ss:$28 sps:$4 sm:$0xff]   ;;  %v4946_v39 = vld [vmem:[%s6626_s7 + $0x518] ss:$28 sps:$4 sm:$0xff]  }
 0x34b   :  { %3541 = vmatpush1.bf16.msra.mxu0 %v4865_v40  ;;  %3582 = vmatpush1.bf16.msra.mxu1 %v4868_v41  ;;  %v4951_v40 = vld [vmem:[%s6626_s7 + $0x35c] ss:$28 sps:$4 sm:$0xff]   ;;  %v4954_v41 = vld [vmem:[%s6626_s7 + $0x4e4] ss:$28 sps:$4 sm:$0xff]  }
 0x34c   :  { %3542 = vmatprep.subr.bf16.mxu0 %v4873_v42  ;;  %3583 = vmatprep.subr.bf16.mxu1 %v4876_v43  ;;  %v4949_v42 = vld [vmem:[%s6626_s7 + $0x358] ss:$28 sps:$4 sm:$0xff]   ;;  %v4952_v43 = vld [vmem:[%s6626_s7 + $0x4e0] ss:$28 sps:$4 sm:$0xff]  }
 0x34f   :  { %3543 = vmatpush1.bf16.msra.mxu0 %v4871_v44  ;;  %3584 = vmatpush1.bf16.msra.mxu1 %v4874_v47  ;;  %v4957_v44 = vld [vmem:[%s6626_s7 + $0x324] ss:$28 sps:$4 sm:$0xff]   ;;  %v4960_v47 = vld [vmem:[%s6626_s7 + $0x4ac] ss:$28 sps:$4 sm:$0xff]  }
 0x350   :  { %3544 = vmatprep.subr.bf16.mxu0 %v4879_v48  ;;  %3585 = vmatprep.subr.bf16.mxu1 %v4882_v49  ;;  %v4955_v48 = vld [vmem:[%s6626_s7 + $0x320] ss:$28 sps:$4 sm:$0xff]   ;;  %v4958_v49 = vld [vmem:[%s6626_s7 + $0x4a8] ss:$28 sps:$4 sm:$0xff]  }
 0x353   :  { %3545 = vmatpush1.bf16.msra.mxu0 %v4877_v50  ;;  %3586 = vmatpush1.bf16.msra.mxu1 %v4880_v51  ;;  %v4963_v50 = vld [vmem:[%s6626_s7 + $0x2ec] ss:$28 sps:$4 sm:$0xff]   ;;  %v4966_v51 = vld [vmem:[%s6626_s7 + $0x474] ss:$28 sps:$4 sm:$0xff]  }
 0x354   :  { %3546 = vmatprep.subr.bf16.mxu0 %v4885_v53  ;;  %3587 = vmatprep.subr.bf16.mxu1 %v4888_v54  ;;  %v4961_v53 = vld [vmem:[%s6626_s7 + $0x2e8] ss:$28 sps:$4 sm:$0xff]   ;;  %v4964_v54 = vld [vmem:[%s6626_s7 + $0x470] ss:$28 sps:$4 sm:$0xff]  }
 0x357   :  { %3547 = vmatpush1.bf16.msra.mxu0 %v4883_v55  ;;  %3588 = vmatpush1.bf16.msra.mxu1 %v4886_v56  ;;  %v4969_v55 = vld [vmem:[%s6626_s7 + $0x2b4] ss:$28 sps:$4 sm:$0xff]   ;;  %v4972_v56 = vld [vmem:[%s6626_s7 + $0x43c] ss:$28 sps:$4 sm:$0xff]  }
 0x358   :  { %3548 = vmatprep.subr.bf16.mxu0 %v4891_v57  ;;  %3589 = vmatprep.subr.bf16.mxu1 %v4894_v58  ;;  %v4967_v57 = vld [vmem:[%s6626_s7 + $0x2b0] ss:$28 sps:$4 sm:$0xff]   ;;  %v4970_v58 = vld [vmem:[%s6626_s7 + $0x438] ss:$28 sps:$4 sm:$0xff]  }
 0x35b   :  { %3549 = vmatpush1.bf16.msra.mxu0 %v4889_v59  ;;  %3590 = vmatpush1.bf16.msra.mxu1 %v4892_v60  ;;  %v4975_v59 = vld [vmem:[%s6626_s7 + $0x27c] ss:$28 sps:$4 sm:$0xff]   ;;  %v4978_v60 = vld [vmem:[%s6626_s7 + $0x404] ss:$28 sps:$4 sm:$0xff]  }
 0x35c   :  { %3550 = vmatprep.subr.bf16.mxu0 %v4897_v61  ;;  %3605 = vmatprep.subr.bf16.mxu1 %v4900_v62  ;;  %v4973_v61 = vld [vmem:[%s6626_s7 + $0x278] ss:$28 sps:$4 sm:$0xff]   ;;  %v4976_v62 = vld [vmem:[%s6626_s7 + $0x400] ss:$28 sps:$4 sm:$0xff]  }
 0x35f   :  { %3551 = vmatpush2.bf16.msra.mxu0 %v4895_v63  ;;  %3606 = vmatpush2.bf16.msra.mxu1 %v4898_v0  ;;  %v4981_v63 = vld [vmem:[%s6626_s7 + $0x244] ss:$28 sps:$4 sm:$0xff]   ;;  %v4984_v0 = vld [vmem:[%s6626_s7 + $0x3cc] ss:$28 sps:$4 sm:$0xff]  }
 0x360   :  { %3552 = vmatprep.subr.bf16.mxu0 %v4903_v1  ;;  %3616 = vmatprep.subr.bf16.mxu1 %v4906_v2  ;;  %v4979_v1 = vld [vmem:[%s6626_s7 + $0x240] ss:$28 sps:$4 sm:$0xff]   ;;  %v4982_v2 = vld [vmem:[%s6626_s7 + $0x3c8] ss:$28 sps:$4 sm:$0xff]  }
 0x362   :  { %3608 = vmatmul.mubr.bf16.vlgmr.msra.gmra.mxu1 %v6196_v6 }
 0x363   :  { %3553 = vmatpush2.bf16.msra.mxu0 %v4901_v3  ;;  %3617 = vmatpush1.bf16.msra.mxu1 %v4904_v4  ;;  %v4987_v3 = vld [vmem:[%s6626_s7 + $0x20c] ss:$28 sps:$4 sm:$0xff]   ;;  %v4990_v4 = vld [vmem:[%s6626_s7 + $0x394] ss:$28 sps:$4 sm:$0xff]  }
 0x364   :  { %3648 = vmatprep.mubr.bf16.mxu1 %v6184_v27  ;;  %3554 = vmatprep.subr.bf16.mxu0 %v4909_v5  ;;  %v4985_v5 = vld [vmem:[%s6626_s7 + $0x208] ss:$28 sps:$4 sm:$0xff]  }
 0x365   :  { %3618 = vmatprep.subr.bf16.mxu1 %v4912_v8  ;;  %v4988_v8 = vld [vmem:[%s6626_s7 + $0x390] ss:$28 sps:$4 sm:$0xff]  }
 0x367   :  { %3555 = vmatpush2.bf16.msra.mxu0 %v4907_v9  ;;  %3619 = vmatpush1.bf16.msra.mxu1 %v4910_v10  ;;  %v4993_v9 = vld [vmem:[%s6626_s7 + $0x1d4] ss:$28 sps:$4 sm:$0xff]  }
 0x368   :  { %3556 = vmatprep.subr.bf16.mxu0 %v4915_v11  ;;  %3620 = vmatprep.subr.bf16.mxu1 %v4918_v12  ;;  %v4996_v10 = vld [vmem:[%s6626_s7 + $0x554] ss:$28 sps:$4 sm:$0xff]  }
 0x369   :  { %v4991_v11 = vld [vmem:[%s6626_s7 + $0x1d0] ss:$28 sps:$4 sm:$0xff]  }
 0x36a   :  { %v4994_v12 = vld [vmem:[%s6626_s7 + $0x550] ss:$28 sps:$4 sm:$0xff]  }
 0x36b   :  { %3557 = vmatpush2.bf16.msra.mxu0 %v4913_v16  ;;  %3621 = vmatpush1.bf16.msra.mxu1 %v4916_v17  ;;  %v4997_v16 = vld [vmem:[%s6626_s7 + $0x360] ss:$28 sps:$4 sm:$0xff]  }
 0x36c   :  { %3558 = vmatprep.subr.bf16.mxu0 %v4921_v18  ;;  %3622 = vmatprep.subr.bf16.mxu1 %v4924_v19  ;;  %v4998_v17 = vld [vmem:[%s6626_s7 + $0x1a0] ss:$28 sps:$4 sm:$0xff]   ;;  %v5000_v19 = vld [vmem:[%s6626_s7 + $0x328] ss:$28 sps:$4 sm:$0xff]  }
 0x36d   :  { %v4999_v18 = vld [vmem:[%s6626_s7 + $0x520] ss:$28 sps:$4 sm:$0xff]  }
 0x36f   :  { %3559 = vmatpush2.bf16.msra.mxu0 %v4919_v20  ;;  %3623 = vmatpush1.bf16.msra.mxu1 %v4922_v21  ;;  %v5001_v20 = vld [vmem:[%s6626_s7 + $0x168] ss:$28 sps:$4 sm:$0xff]  }
 0x370   :  { %3560 = vmatprep.subr.bf16.mxu0 %v4927_v22  ;;  %3624 = vmatprep.subr.bf16.mxu1 %v4930_v23  ;;  %v5002_v21 = vld [vmem:[%s6626_s7 + $0x4e8] ss:$28 sps:$4 sm:$0xff]   ;;  %v5003_v22 = vld [vmem:[%s6626_s7 + $0x2f0] ss:$28 sps:$4 sm:$0xff]   ;;  %v5006_v23 = vld [vmem:[%s6626_s7 + $0x2b8] ss:$28 sps:$4 sm:$0xff]  }
 0x373   :  { %3561 = vmatpush2.bf16.msra.mxu0 %v4925_v26  ;;  %3625 = vmatpush1.bf16.msra.mxu1 %v4928_v52  ;;  %v5007_v26 = vld [vmem:[%s6626_s7 + $0xf8] ss:$28 sps:$4 sm:$0xff]  }
 0x374   :  { %3562 = vmatprep.subr.bf16.mxu0 %v4933_v14  ;;  %3626 = vmatprep.subr.bf16.mxu1 %v4936_v28  ;;  %v5008_v52 = vld [vmem:[%s6626_s7 + $0x478] ss:$28 sps:$4 sm:$0xff]   ;;  %v5009_v14 = vld [vmem:[%s6626_s7 + $0x280] ss:$28 sps:$4 sm:$0xff]  }
 0x375   :  { %v5010_v28 = vld [vmem:[%s6626_s7 + $0xc0] ss:$28 sps:$4 sm:$0xff]  }
 0x377   :  { %3563 = vmatpush2.bf16.msra.mxu0 %v4931_v30  ;;  %3627 = vmatpush1.bf16.msra.mxu1 %v4934_v31  ;;  %v5011_v30 = vld [vmem:[%s6626_s7 + $0x440] ss:$28 sps:$4 sm:$0xff]   ;;  %v5012_v31 = vld [vmem:[%s6626_s7 + $0x248] ss:$28 sps:$4 sm:$0xff]  }
 0x378   :  { %3564 = vmatprep.subr.bf16.mxu0 %v4939_v32  ;;  %3628 = vmatprep.subr.bf16.mxu1 %v4942_v34  ;;  %v5013_v32 = vld [vmem:[%s6626_s7 + $0x88] ss:$28 sps:$4 sm:$0xff]  }
 0x379   :  { %v5014_v34 = vld [vmem:[%s6626_s7 + $0x408] ss:$28 sps:$4 sm:$0xff]  }
 0x37b   :  { %3565 = vmatpush2.bf16.msra.mxu0 %v4937_v33  ;;  %3629 = vmatpush1.bf16.msra.mxu1 %v4940_v35  ;;  %v5015_v33 = vld [vmem:[%s6626_s7 + $0x210] ss:$28 sps:$4 sm:$0xff]  }
 0x37c   :  { %3630 = vmatprep.subr.bf16.mxu1 %v4945_v36  ;;  %3657 = vmatprep.subr.bf16.mxu0 %v4948_v37  ;;  %v5016_v35 = vld [vmem:[%s6626_s7 + $0x50] ss:$28 sps:$4 sm:$0xff]   ;;  %v5018_v37 = vld [vmem:[%s6626_s7 + $0x1d8] ss:$28 sps:$4 sm:$0xff]  }
 0x37d   :  { %v5017_v36 = vld [vmem:[%s6626_s7 + $0x3d0] ss:$28 sps:$4 sm:$0xff]  }
 0x37e   :  { %3567 = vmatmul.mubr.bf16.vlgmr.msra.gmra.mxu0 %v6194_v29 }
 0x37f   :  { %3631 = vmatpush1.bf16.msra.mxu1 %v4943_v38  ;;  %3658 = vmatpush1.bf16.msra.mxu0 %v4946_v39  ;;  %v5019_v38 = vld [vmem:[%s6626_s7 + $0x18] ss:$28 sps:$4 sm:$0xff]  }
 0x380   :  { %4315 = vmatprep.mubr.msk.bf16.mxu0 %vm1264_vm0, %v6186_v15  ;;  %3632 = vmatprep.subr.bf16.mxu1 %v4951_v40  ;;  %v5020_v39 = vld [vmem:[%s6626_s7 + $0x398] ss:$28 sps:$4 sm:$0xff]  }
 0x381   :  { %3659 = vmatprep.subr.bf16.mxu0 %v4954_v41  ;;  %v5021_v40 = vld [vmem:[%s6626_s7 + $0x558] ss:$28 sps:$4 sm:$0xff]   ;;  %v6593_v41 = vld [vmem:[%s6631_s8] sm:$0x7f] }
 0x383   :  { %3633 = vmatpush2.bf16.msra.mxu1 %v4949_v42  ;;  %3660 = vmatpush1.bf16.msra.mxu0 %v4952_v43  ;;  %v2517_v42 = vrot.slane %v6593_v41, %v5890_v25  ;;  %v2521_v43 = vrot.slane %v6593_v41, %v5896_v7 }
 0x384   :  { %3634 = vmatprep.subr.bf16.mxu1 %v4957_v44  ;;  %3661 = vmatprep.subr.bf16.mxu0 %v4960_v47 }
 0x387   :  { %3635 = vmatpush2.bf16.msra.mxu1 %v4955_v48  ;;  %3662 = vmatpush1.bf16.msra.mxu0 %v4958_v49 }
 0x388   :  { %3636 = vmatprep.subr.bf16.mxu1 %v4963_v50  ;;  %3663 = vmatprep.subr.bf16.mxu0 %v4966_v51 }
 0x38b   :  { %3637 = vmatpush2.bf16.msra.mxu1 %v4961_v53  ;;  %3664 = vmatpush1.bf16.msra.mxu0 %v4964_v54 }
 0x38c   :  { %3638 = vmatprep.subr.bf16.mxu1 %v4969_v55  ;;  %3665 = vmatprep.subr.bf16.mxu0 %v4972_v56 }
 0x38f   :  { %3639 = vmatpush2.bf16.msra.mxu1 %v4967_v57  ;;  %3666 = vmatpush1.bf16.msra.mxu0 %v4970_v58 }
 0x390   :  { %3640 = vmatprep.subr.bf16.mxu1 %v4975_v59  ;;  %3667 = vmatprep.subr.bf16.mxu0 %v4978_v60 }
 0x393   :  { %3641 = vmatpush2.bf16.msra.mxu1 %v4973_v61  ;;  %3668 = vmatpush1.bf16.msra.mxu0 %v4976_v62 }
 0x394   :  { %3642 = vmatprep.subr.bf16.mxu1 %v4981_v63  ;;  %3669 = vmatprep.subr.bf16.mxu0 %v4984_v0 }
 0x397   :  { %3643 = vmatpush2.bf16.msra.mxu1 %v4979_v1  ;;  %3670 = vmatpush1.bf16.msra.mxu0 %v4982_v2 }
 0x398   :  { %3644 = vmatprep.subr.bf16.mxu1 %v4987_v3  ;;  %3671 = vmatprep.subr.bf16.mxu0 %v4990_v4  ;;  %v2525_v3 = vrot.slane %v6593_v41, %v5902_v45  ;;  %v2529_v4 = vrot.slane %v6593_v41, %v5905_v46  ;;  %v2532_v46 = vsub.s32 4, %v5887_v24 }
 0x39b   :  { %3645 = vmatpush2.bf16.msra.mxu1 %v4985_v5  ;;  %3672 = vmatpush1.bf16.msra.mxu0 %v4988_v8 }
 0x39c   :  { %3646 = vmatprep.subr.bf16.mxu1 %v4993_v9  ;;  %3687 = vmatprep.subr.bf16.mxu0 %v4996_v10 }
 0x39f   :  { %3647 = vmatpush2.bf16.msra.mxu1 %v4991_v11  ;;  %3688 = vmatpush2.bf16.msra.mxu0 %v4994_v12 }
 0x3a0   :  { %4325 = vmatprep.subr.bf16.mxu0 %v4997_v16  ;;  %3738 = vmatprep.subr.bf16.mxu1 %v5038_v13 }
 0x3a2   :  { %3649 = vmatmul.mubr.bf16.vlgmr.msra.gmra.mxu1 %v6194_v29  ;;  %3690 = vmatmul.mubr.bf16.vlgmr.msra.gmra.mxu0 %v6196_v6 }
 0x3a3   :  { %4326 = vmatpush3.bf16.msra.mxu0 %v4998_v17  ;;  %3730 = vmatprep.mubr.bf16.mxu0 %v6184_v27  ;;  %v5004_v27 = vld [vmem:[%s6626_s7 + $0x130] ss:$28 sps:$4 sm:$0xff]  }
 0x3a4   :  { %3739 = vmatpush1.bf16.msra.mxu1 %v4999_v18  ;;  %4316 = vmatprep.mubr.msk.bf16.mxu1 %vm1264_vm0, %v6186_v15  ;;  %v5005_v15 = vld [vmem:[%s6626_s7 + $0x4b0] ss:$28 sps:$4 sm:$0xff]  }
 0x3a5   :  { %4327 = vmatprep.subr.bf16.mxu0 %v5000_v19  ;;  %3740 = vmatprep.subr.bf16.mxu1 %v5038_v13 }
 0x3a7   :  { %4328 = vmatpush3.bf16.msra.mxu0 %v5001_v20 }
 0x3a8   :  { %3741 = vmatpush1.bf16.msra.mxu1 %v5002_v21  ;;  %4329 = vmatprep.subr.bf16.mxu0 %v5003_v22 }
 0x3a9   :  { %3742 = vmatprep.subr.bf16.mxu1 %v5038_v13 }
 0x3ab   :  { %4330 = vmatpush3.bf16.msra.mxu0 %v5004_v27 }
 0x3ac   :  { %3743 = vmatpush1.bf16.msra.mxu1 %v5005_v15  ;;  %4331 = vmatprep.subr.bf16.mxu0 %v5006_v23 }
 0x3ad   :  { %3744 = vmatprep.subr.bf16.mxu1 %v5038_v13 }
 0x3af   :  { %4332 = vmatpush3.bf16.msra.mxu0 %v5007_v26  ;;  %v2536_v26 = vsub.s32 5, %v5887_v24 }
 0x3b0   :  { %3745 = vmatpush1.bf16.msra.mxu1 %v5008_v52  ;;  %4333 = vmatprep.subr.bf16.mxu0 %v5009_v14  ;;  %v2533_v52 = vrot.slane %v6593_v41, %v2532_v46 }
 0x3b1   :  { %3746 = vmatprep.subr.bf16.mxu1 %v5038_v13  ;;  %v2537_v14 = vrot.slane %v6593_v41, %v2536_v26 }
 0x3b3   :  { %4334 = vmatpush3.bf16.msra.mxu0 %v5010_v28 }
 0x3b4   :  { %3747 = vmatpush1.bf16.msra.mxu1 %v5011_v30  ;;  %4335 = vmatprep.subr.bf16.mxu0 %v5012_v31 }
 0x3b5   :  { %3748 = vmatprep.subr.bf16.mxu1 %v5038_v13 }
 0x3b7   :  { %4336 = vmatpush3.bf16.msra.mxu0 %v5013_v32 }
 0x3b8   :  { %3749 = vmatpush1.bf16.msra.mxu1 %v5014_v34  ;;  %4337 = vmatprep.subr.bf16.mxu0 %v5015_v33 }
 0x3b9   :  { %3750 = vmatprep.subr.bf16.mxu1 %v5038_v13 }
 0x3bb   :  { %4338 = vmatpush3.bf16.msra.mxu0 %v5016_v35 }
 0x3bc   :  { %3751 = vmatpush1.bf16.msra.mxu1 %v5017_v36  ;;  %4339 = vmatprep.subr.bf16.mxu0 %v5018_v37 }
 0x3bd   :  { %3752 = vmatprep.subr.bf16.mxu1 %v5038_v13 }
 0x3bf   :  { %4340 = vmatpush3.bf16.msra.mxu0 %v5019_v38 }
 0x3c0   :  { %3753 = vmatpush1.bf16.msra.mxu1 %v5020_v39 }
 0x3c1   :  { %3768 = vmatprep.subr.bf16.mxu1 %v5038_v13 }
 0x3c2   :  { %3731 = vmatmul.mubr.bf16.vlgmr.msra.gmra.mxu0 %v6194_v29 }
 0x3c4   :  { %3769 = vmatpush2.bf16.msra.mxu1 %v5021_v40 }
 0x3c7   :  { %3771 = vmatmul.mubr.bf16.vlgmr.msra.gmra.mxu1 %v6196_v6 }
 0x3fe   :  { %v3486_v44 = vpop.f32.mrf.mxu1  ;;  %v3527_v47 = vpop.f32.mrf.mxu0 }
 0x3ff   :  { %v3487_v48 = vadd.f32 %v3486_v44, %v2517_v42 }
 0x400   :  { %v3488_v13 = vpop.f32.mrf.mxu1  ;;  %v3529_v49 = vpop.f32.mrf.mxu0 }
 0x401   :  { %v3528_v29 = vadd.f32 %v3527_v47, %v3487_v48  ;;  %v3489_v50 = vadd.f32 %v3488_v13, %v2521_v43 }
 0x402   :  { %v3490_v51 = vpop.f32.mrf.mxu1  ;;  %v3531_v6 = vpop.f32.mrf.mxu0 }
 0x403   :  { %v3778_v53 = vmul.f32 0.5, %v3528_v29  ;;  %v3530_v54 = vadd.f32 %v3529_v49, %v3489_v50  ;;  %v2540_v51 = vsub.s32 6, %v5887_v24 }
 0x404   :  { %v3491_v55 = vpop.f32.mrf.mxu1  ;;  %v3532_v56 = vpop.f32.mrf.mxu0 }
 0x405   :  { %5024 = vtanh.f32 %v3778_v53  ;;  %v3779_v57 = vmul.f32 0.5, %v3530_v54  ;;  %v2541_v53 = vrot.slane %v6593_v41, %v2540_v51 }
 0x407   :  { %5026 = vtanh.f32 %v3779_v57 }
 0x412   :  { %v5025_v25 = vpop.eup %5024 }
 0x413   :  { %v3792_v58 = vadd.f32 1.0, %v5025_v25 }
 0x414   :  { %v5027_v59 = vpop.eup %5026 }
 0x415   :  { %v3793_v7 = vadd.f32 1.0, %v5027_v59  ;;  %v3799_v60 = vmul.f32 0.5, %v3792_v58 }
 0x417   :  { %v3800_v61 = vmul.f32 0.5, %v3793_v7 }
 0x419   :  { %v4321_v62 = vpack.c.bf16 %v3800_v61, %v3799_v60 }
 0x41b   :  { %3835 = vst [vmem:[%s6632_s10] sm:$0xff] %v4321_v62 }
 0x422   :  { %v3609_v63 = vpop.f32.mrf.mxu1 }
 0x424   :  { %v3611_v0 = vpop.f32.mrf.mxu1 }
 0x426   :  { %v3613_v1 = vpop.f32.mrf.mxu1 }
 0x428   :  { %v3614_v2 = vpop.f32.mrf.mxu1 }
 0x43e   :  { %v3568_v5 = vpop.f32.mrf.mxu0 }
 0x43f   :  { %v3569_v8 = vadd.f32 %v3568_v5, %v2525_v3 }
 0x440   :  { %v3570_v9 = vpop.f32.mrf.mxu0 }
 0x441   :  { %v3610_v10 = vadd.f32 %v3609_v63, %v3569_v8  ;;  %v3571_v11 = vadd.f32 %v3570_v9, %v2529_v4 }
 0x442   :  { %v3572_v12 = vpop.f32.mrf.mxu0 }
 0x443   :  { %v3780_v16 = vmul.f32 0.5, %v3610_v10  ;;  %v3612_v17 = vadd.f32 %v3611_v0, %v3571_v11 }
 0x444   :  { %v3573_v18 = vpop.f32.mrf.mxu0 }
 0x445   :  { %5028 = vtanh.f32 %v3780_v16  ;;  %v3781_v19 = vmul.f32 0.5, %v3612_v17 }
 0x447   :  { %5030 = vtanh.f32 %v3781_v19 }
 0x452   :  { %v5029_v20 = vpop.eup %5028 }
 0x453   :  { %v3794_v21 = vadd.f32 1.0, %v5029_v20 }
 0x454   :  { %v5031_v22 = vpop.eup %5030 }
 0x455   :  { %v3795_v27 = vadd.f32 1.0, %v5031_v22  ;;  %v3801_v45 = vmul.f32 0.5, %v3794_v21 }
 0x457   :  { %v3802_v15 = vmul.f32 0.5, %v3795_v27 }
 0x459   :  { %v4322_v23 = vpack.c.bf16 %v3802_v15, %v3801_v45 }
 0x45b   :  { %3836 = vst [vmem:[%s6632_s10 + $0x8] sm:$0xff] %v4322_v23 }
 0x462   :  { %v3650_v28 = vpop.f32.mrf.mxu1  ;;  %v3691_v30 = vpop.f32.mrf.mxu0 }
 0x463   :  { %v3651_v31 = vadd.f32 %v3650_v28, %v2533_v52 }
 0x464   :  { %v3652_v32 = vpop.f32.mrf.mxu1  ;;  %v3693_v34 = vpop.f32.mrf.mxu0 }
 0x465   :  { %v3692_v33 = vadd.f32 %v3691_v30, %v3651_v31  ;;  %v3653_v35 = vadd.f32 %v3652_v32, %v2537_v14 }
 0x466   :  { %v3654_v36 = vpop.f32.mrf.mxu1  ;;  %v3695_v37 = vpop.f32.mrf.mxu0 }
 0x467   :  { %v3782_v38 = vmul.f32 0.5, %v3692_v33  ;;  %v3694_v39 = vadd.f32 %v3693_v34, %v3653_v35 }
 0x468   :  { %v3655_v40 = vpop.f32.mrf.mxu1  ;;  %v3696_v42 = vpop.f32.mrf.mxu0 }
 0x469   :  { %5032 = vtanh.f32 %v3782_v38  ;;  %v3783_v43 = vmul.f32 0.5, %v3694_v39 }
 0x46b   :  { %5034 = vtanh.f32 %v3783_v43 }
 0x476   :  { %v5033_v44 = vpop.eup %5032 }
 0x477   :  { %v3796_v47 = vadd.f32 1.0, %v5033_v44 }
 0x478   :  { %v5035_v48 = vpop.eup %5034 }
 0x479   :  { %v3797_v13 = vadd.f32 1.0, %v5035_v48  ;;  %v3803_v49 = vmul.f32 0.5, %v3796_v47 }
 0x47b   :  { %v3804_v29 = vmul.f32 0.5, %v3797_v13 }
 0x47d   :  { %v4323_v50 = vpack.c.bf16 %v3804_v29, %v3803_v49 }
 0x47f   :  { %3837 = vst [vmem:[%s6632_s10 + $0x10] sm:$0xff] %v4323_v50 }
 0x482   :  { %v4341_v6 = vpop.f32.mrf.mxu0 }
 0x484   :  { %v4342_v54 = vpop.f32.mrf.mxu0 }
 0x485   :  { %v4343_v55 = vadd.f32 %v4342_v54, %v4341_v6 }
 0x486   :  { %v4344_v56 = vpop.f32.mrf.mxu0 }
 0x487   :  { %v3733_v57 = vadd.f32 %v4343_v55, %v2541_v53  ;;  %v3772_v25 = vpop.f32.mrf.mxu1 }
 0x488   :  { %v4345_v58 = vpop.f32.mrf.mxu0 }
 0x489   :  { %v3773_v59 = vadd.f32 %v3772_v25, %v3733_v57  ;;  %v3774_v7 = vpop.f32.mrf.mxu1 }
 0x48b   :  { %v3784_v60 = vmul.f32 0.5, %v3773_v59  ;;  %v3775_v61 = vpop.f32.mrf.mxu1 }
 0x48d   :  { %5036 = vtanh.f32 %v3784_v60  ;;  %v3776_v62 = vpop.f32.mrf.mxu1 }
 0x49a   :  { %v5037_v63 = vpop.eup %5036 }
 0x49b   :  { %v3798_v0 = vadd.f32 1.0, %v5037_v63 }
 0x49d   :  { %v3805_v1 = vmul.f32 0.5, %v3798_v0 }
 0x49f   :  { %v4324_v24 = vpack.c.bf16 %v3805_v1, %v3805_v1 }
 0x4a1   :  { %3839 = vst.msk [vmem:[%s6632_s10 + $0x18] sm:$0xf] %vm3838_vm1, %v4324_v24 }

</bundles_post_ra>
